<compile_context>
chip_gen: v7x
topology: tpu7x:2x2x1
jax: 0.10.0
libtpu: 0.0.40
codegen_flags: <defaults>
</compile_context>

<pallas_src>
import jax
import jax.numpy as jnp
from jax.experimental import pallas as pl
from jax.experimental.pallas import tpu as pltpu

EPS = 1e-5
LANE = 128


def _round_up(n, m):
    return ((n + m - 1) // m) * m


# ---------------------------------------------------------------------------
# Kernel
# ---------------------------------------------------------------------------
def _bottleneck_kernel(x_ref, w1r_ref, t1r_ref, w2_ref, t2_ref, w3_ref, t3_ref,
                       out_ref):
    # x_ref  : (H+2, W, Cin)  one batch element, zero-padded along H, bf16
    # w1r_ref: (Cin, C+Ce)    fused [conv1 | residual] 1x1 weights (BN scale folded), bf16
    # t1r_ref: (1, C+Ce)      fused BN shifts, f32
    # w2_ref : (3, 3*C, C)    3x3 conv weights laid out (ky, kx*cin, cout), bf16
    # t2_ref : (1, C)         f32
    # w3_ref : (C, Ce)        conv3 1x1 weights, bf16
    # t3_ref : (1, Ce)        f32
    # out_ref: (TH, W, Ce)    one row-tile of the output, f32
    Hp2, W, _ = x_ref.shape
    H = Hp2 - 2
    TH, _, Ce = out_ref.shape
    C = w2_ref.shape[2]

    t = pl.program_id(1)
    row0 = pl.multiple_of(t * TH, TH)         # start row (padded coords) of halo window

    # ---- fused conv1 + residual projection (1x1) on TH+2 rows (incl. 1-row halo) ----
    xw = x_ref[pl.ds(row0, TH + 2), :, :]                         # (TH+2, W, Cin) bf16
    xm = xw.reshape((TH + 2) * W, xw.shape[-1])
    z = jnp.dot(xm, w1r_ref[...], preferred_element_type=jnp.float32)
    z = jnp.maximum(z + t1r_ref[...], 0.0)                        # ((TH+2)*W, C+Ce) f32

    # residual branch: central TH rows only (always real rows)
    r = z[:, C:].reshape(TH + 2, W, Ce)[1:TH + 1].reshape(TH * W, Ce)

    # conv1 output; rows that correspond to conv2's zero padding must be zero
    h1f = z[:, :C].reshape(TH + 2, W, C)
    top_ok = jnp.where(row0 >= 1, 1.0, 0.0)                       # first tile -> 0
    bot_ok = jnp.where(row0 + TH + 1 <= H, 1.0, 0.0)              # last tile  -> 0
    h1 = jnp.concatenate(
        [h1f[0:1] * top_ok, h1f[1:TH + 1], h1f[TH + 1:TH + 2] * bot_ok],
        axis=0).astype(jnp.bfloat16)                              # (TH+2, W, C)

    # ---- conv2: 3x3, stride 1, pad 1 -- im2col along kx, 3 matmuls with K=3*C ----
    zcol = jnp.zeros((TH, 1, C), jnp.bfloat16)
    acc = jnp.zeros((TH * W, C), jnp.float32)
    for ky in range(3):
        a = h1[ky:ky + TH]                                        # row tap ky-1, (TH, W, C)
        left = jnp.concatenate([zcol, a[:, :-1, :]], axis=1)      # col tap -1
        right = jnp.concatenate([a[:, 1:, :], zcol], axis=1)      # col tap +1
        patch = jnp.concatenate([left, a, right], axis=-1)        # (TH, W, 3*C)
        acc = acc + jnp.dot(patch.reshape(TH * W, 3 * C), w2_ref[ky],
                            preferred_element_type=jnp.float32)
    h2 = jnp.maximum(acc + t2_ref[...], 0.0).astype(jnp.bfloat16)

    # ---- conv3: 1x1 + shift + ReLU ----
    h3 = jnp.dot(h2, w3_ref[...], preferred_element_type=jnp.float32)
    h3 = jnp.maximum(h3 + t3_ref[...], 0.0)

    out_ref[...] = (h3 + r).reshape(TH, W, Ce).astype(out_ref.dtype)


# ---------------------------------------------------------------------------
# Wrapper + parameter preparation
# ---------------------------------------------------------------------------
def prepare_params(raw_params):
    """Fold BN scale into conv weights, fuse conv1+residual, pad channels to the
    128-lane width, cast matmul operands to bf16."""
    (w1, s1, t1), (w2, s2, t2), (w3, s3, t3), (wr, sr, tr) = raw_params
    Cin, C = w1.shape[2], w1.shape[3]
    Ce = w3.shape[3]
    Cin_p, C_p, Ce_p = (_round_up(c, LANE) for c in (Cin, C, Ce))

    def fold(w, s):                                   # BN scale -> conv weight
        return w * s.reshape((1,) * (w.ndim - 1) + (-1,))

    w1f = fold(w1, s1)[0, 0]                          # (Cin, C)
    wrf = fold(wr, sr)[0, 0]                          # (Cin, Ce)
    w2f = fold(w2, s2)                                # (3, 3, C, C)
    w3f = fold(w3, s3)[0, 0]                          # (C, Ce)

    pad2 = lambda w, r, c: jnp.pad(w, ((0, r - w.shape[0]), (0, c - w.shape[1])))
    pad1 = lambda v, n: jnp.pad(v, (0, n - v.shape[0]))

    w1r = jnp.concatenate([pad2(w1f, Cin_p, C_p), pad2(wrf, Cin_p, Ce_p)],
                          axis=1).astype(jnp.bfloat16)              # (Cin_p, C_p+Ce_p)
    t1r = jnp.concatenate([pad1(t1, C_p), pad1(tr, Ce_p)]).reshape(1, -1)

    w2p = jnp.pad(w2f, ((0, 0), (0, 0), (0, C_p - C), (0, C_p - C)))
    w2r = w2p.reshape(3, 3 * C_p, C_p).astype(jnp.bfloat16)          # (ky, kx*cin, cout)
    t2p = pad1(t2, C_p).reshape(1, -1)

    w3p = pad2(w3f, C_p, Ce_p).astype(jnp.bfloat16)
    t3p = pad1(t3, Ce_p).reshape(1, -1)

    kparams = (w1r, t1r.astype(jnp.float32), w2r, t2p.astype(jnp.float32),
               w3p, t3p.astype(jnp.float32))
    return kparams, (Cin_p, Ce_p, Ce)


def res_bottleneck_block(x_nchw, kparams, dims, stride=1, tile_h=8):
    """x_nchw: (N, Cin, H, W) f32.  Returns (N, 4*out_ch, H, W) f32."""
    assert stride == 1, "only stride=1 supported in this kernel"
    w1r, t1r, w2r, t2, w3, t3 = kparams
    Cin_p, Ce_p, Ce = dims

    x = jnp.transpose(x_nchw, (0, 2, 3, 1))                  # -> NHWC
    N, H, W, Cin = x.shape
    th = tile_h if (H % tile_h == 0) else H

    # zero-pad H by the 3x3 halo, pad channels to lane width, bf16 matmul operand
    x_p = jnp.pad(x, ((0, 0), (1, 1), (0, 0), (0, Cin_p - Cin))).astype(jnp.bfloat16)

    full = lambda a: pl.BlockSpec(a.shape, lambda n, t: (0,) * a.ndim)

    out = pl.pallas_call(
        _bottleneck_kernel,
        out_shape=jax.ShapeDtypeStruct((N, H, W, Ce_p), jnp.float32),
        grid_spec=pltpu.PrefetchScalarGridSpec(
            num_scalar_prefetch=0,
            grid=(N, H // th),
            in_specs=[
                pl.BlockSpec((None, H + 2, W, Cin_p), lambda n, t: (n, 0, 0, 0)),
                full(w1r), full(t1r),
                full(w2r), full(t2),
                full(w3), full(t3),
            ],
            out_specs=pl.BlockSpec((None, th, W, Ce_p), lambda n, t: (n, t, 0, 0)),
        ),
        compiler_params=pltpu.CompilerParams(
            dimension_semantics=("parallel", "parallel"),
            vmem_limit_bytes=32 * 1024 * 1024),
    )(x_p, w1r, t1r, w2r, t2, w3, t3)

    out = out[..., :Ce]                                      # drop channel padding
    return jnp.transpose(out, (0, 3, 1, 2))                  # back to NCHW


# ---------------------------------------------------------------------------
# Deterministic parameter construction (Conv weight + BN folded to scale/shift)
# ---------------------------------------------------------------------------
def make_bnconv_params(key, cin, cout, k):
    kw, kg, kb, km, kv = jax.random.split(key, 5)
    w = 0.1 * jax.random.normal(kw, (k, k, cin, cout), jnp.float32)   # HWIO
    gamma = 1.0 + 0.1 * jax.random.normal(kg, (cout,), jnp.float32)
    beta = 0.1 * jax.random.normal(kb, (cout,), jnp.float32)
    mean = 0.1 * jax.random.normal(km, (cout,), jnp.float32)
    var = 1.0 + 0.1 * jax.random.uniform(kv, (cout,), jnp.float32)
    scale = gamma / jnp.sqrt(var + EPS)
    shift = beta - mean * scale
    return w, scale, shift


# ---------------------------------------------------------------------------
# Plain-JAX reference (NHWC convs, f32) for validation
# ---------------------------------------------------------------------------
def _conv_bn_relu_ref(x, w, scale, shift, stride, padding):
    y = jax.lax.conv_general_dilated(
        x, w, window_strides=(stride, stride),
        padding=[(padding, padding), (padding, padding)],
        dimension_numbers=('NHWC', 'HWIO', 'NHWC'))
    y = y * scale[None, None, None, :] + shift[None, None, None, :]
    return jnp.maximum(y, 0.0)


def ref_block(x_nchw, raw_params, stride=1):
    x = jnp.transpose(x_nchw, (0, 2, 3, 1))
    (w1, s1, t1), (w2, s2, t2), (w3, s3, t3), (wr, sr, tr) = raw_params
    h = _conv_bn_relu_ref(x, w1, s1, t1, 1, 0)
    h = _conv_bn_relu_ref(h, w2, s2, t2, stride, 1)
    h = _conv_bn_relu_ref(h, w3, s3, t3, 1, 0)
    r = _conv_bn_relu_ref(x, wr, sr, tr, stride, 0)
    return jnp.transpose(h + r, (0, 3, 1, 2))


if __name__ == "__main__":
    N, in_ch, H, W = 2, 4, 16, 16
    out_ch, stride = 8, 1
    expansion = 4
    expans_ch = out_ch * expansion

    key = jax.random.PRNGKey(0)
    kx, k1, k2, k3, kr = jax.random.split(key, 5)

    x = jax.random.normal(kx, (N, in_ch, H, W), jnp.float32)

    raw1 = make_bnconv_params(k1, in_ch, out_ch, 1)
    raw2 = make_bnconv_params(k2, out_ch, out_ch, 3)
    raw3 = make_bnconv_params(k3, out_ch, expans_ch, 1)
    rawr = make_bnconv_params(kr, in_ch, expans_ch, 1)   # projection (in_ch != expans_ch)
    raw_params = (raw1, raw2, raw3, rawr)

    kparams, dims = prepare_params(raw_params)

    out = res_bottleneck_block(x, kparams, dims, stride=stride)
    out = jax.block_until_ready(out)

    ref = ref_block(x, raw_params, stride=stride)
    assert out.shape == (N, expans_ch, H, W), out.shape
    max_err = float(jnp.max(jnp.abs(out - ref)))
    # bf16 matmul inputs (f32 accumulation) -> tolerance loosened vs. pure-f32 path
    assert jnp.allclose(out, ref, atol=3e-2, rtol=3e-2), max_err

    print("KERNEL_OK")
</pallas_src>

<mosaic_0001>
module attributes {stable_mosaic.version = 11 : i64} {
  func.func @_bottleneck_kernel(%arg0: i32, %arg1: i32, %arg2: memref<1x18x16x128xbf16, #tpu.memory_space<vmem>>, %arg3: memref<128x256xbf16, #tpu.memory_space<vmem>>, %arg4: memref<1x256xf32, #tpu.memory_space<vmem>>, %arg5: memref<3x384x128xbf16, #tpu.memory_space<vmem>>, %arg6: memref<1x128xf32, #tpu.memory_space<vmem>>, %arg7: memref<128x128xbf16, #tpu.memory_space<vmem>>, %arg8: memref<1x128xf32, #tpu.memory_space<vmem>>, %arg9: memref<1x8x16x128xf32, #tpu.memory_space<vmem>>) attributes {dimension_semantics = [#tpu.dimension_semantics<parallel>, #tpu.dimension_semantics<parallel>], iteration_bounds = array<i64: 2, 2>, scalar_prefetch = 0 : i64, scratch_operands = 0 : i64, tpu.core_type = #tpu.core_type<tc>, window_params = [{transform_indices = @transform_0, window_bounds = array<i64: 1, 18, 16, 128>}, {pipeline_mode = #tpu.pipeline_mode<synchronous>, transform_indices = @transform_1, window_bounds = array<i64: 128, 256>}, {pipeline_mode = #tpu.pipeline_mode<synchronous>, transform_indices = @transform_2, window_bounds = array<i64: 1, 256>}, {pipeline_mode = #tpu.pipeline_mode<synchronous>, transform_indices = @transform_3, window_bounds = array<i64: 3, 384, 128>}, {pipeline_mode = #tpu.pipeline_mode<synchronous>, transform_indices = @transform_4, window_bounds = array<i64: 1, 128>}, {pipeline_mode = #tpu.pipeline_mode<synchronous>, transform_indices = @transform_5, window_bounds = array<i64: 128, 128>}, {pipeline_mode = #tpu.pipeline_mode<synchronous>, transform_indices = @transform_6, window_bounds = array<i64: 1, 128>}, {transform_indices = @transform_7, window_bounds = array<i64: 1, 8, 16, 128>}]} {
    %c8_i32 = arith.constant 8 : i32
    %0 = arith.muli %arg1, %c8_i32 : i32
    %1 = tpu.assume_multiple %0, 8 : i32
    %c0 = arith.constant 0 : index
    %2 = arith.index_cast %1 : i32 to index
    %c0_0 = arith.constant 0 : index
    %c0_1 = arith.constant 0 : index
    %3 = vector.load %arg2[%c0, %2, %c0_0, %c0_1] : memref<1x18x16x128xbf16, #tpu.memory_space<vmem>>, vector<1x10x16x128xbf16>
    %4 = vector.shape_cast %3 : vector<1x10x16x128xbf16> to vector<10x16x128xbf16>
    %5 = vector.shape_cast %4 : vector<10x16x128xbf16> to vector<160x128xbf16>
    %c0_2 = arith.constant 0 : index
    %c0_3 = arith.constant 0 : index
    %6 = vector.load %arg3[%c0_2, %c0_3] : memref<128x256xbf16, #tpu.memory_space<vmem>>, vector<128x256xbf16>
    %cst = arith.constant dense<0.000000e+00> : vector<160x256xf32>
    %7 = tpu.matmul %5, %6, %cst {dimension_numbers = #tpu.dot_dimension_numbers<[1], [0], [0], [1], [0, 0, 1, 1], [], []>} : vector<160x128xbf16>, vector<128x256xbf16>, vector<160x256xf32> -> vector<160x256xf32>
    %c0_4 = arith.constant 0 : index
    %c0_5 = arith.constant 0 : index
    %8 = vector.load %arg4[%c0_4, %c0_5] : memref<1x256xf32, #tpu.memory_space<vmem>>, vector<1x256xf32>
    %9 = vector.broadcast %8 : vector<1x256xf32> to vector<160x256xf32>
    %10 = arith.addf %7, %9 : vector<160x256xf32>
    %cst_6 = arith.constant 0.000000e+00 : f32
    %11 = vector.broadcast %cst_6 : f32 to vector<160x256xf32>
    %12 = arith.maximumf %10, %11 : vector<160x256xf32>
    %13 = vector.extract_strided_slice %12 {offsets = [0, 128], sizes = [160, 128], strides = [1, 1]} : vector<160x256xf32> to vector<160x128xf32>
    %14 = vector.shape_cast %13 : vector<160x128xf32> to vector<10x16x128xf32>
    %15 = vector.extract_strided_slice %14 {offsets = [1, 0, 0], sizes = [8, 16, 128], strides = [1, 1, 1]} : vector<10x16x128xf32> to vector<8x16x128xf32>
    %16 = vector.shape_cast %15 : vector<8x16x128xf32> to vector<128x128xf32>
    %17 = vector.extract_strided_slice %12 {offsets = [0, 0], sizes = [160, 128], strides = [1, 1]} : vector<160x256xf32> to vector<160x128xf32>
    %18 = vector.shape_cast %17 : vector<160x128xf32> to vector<10x16x128xf32>
    %c1_i32 = arith.constant 1 : i32
    %19 = arith.cmpi sge, %1, %c1_i32 : i32
    %cst_7 = arith.constant 1.000000e+00 : f32
    %cst_8 = arith.constant 0.000000e+00 : f32
    %20 = arith.select %19, %cst_7, %cst_8 : f32
    %c8_i32_9 = arith.constant 8 : i32
    %21 = arith.addi %1, %c8_i32_9 : i32
    %c1_i32_10 = arith.constant 1 : i32
    %22 = arith.addi %21, %c1_i32_10 : i32
    %c16_i32 = arith.constant 16 : i32
    %23 = arith.cmpi sle, %22, %c16_i32 : i32
    %cst_11 = arith.constant 1.000000e+00 : f32
    %cst_12 = arith.constant 0.000000e+00 : f32
    %24 = arith.select %23, %cst_11, %cst_12 : f32
    %25 = vector.extract_strided_slice %18 {offsets = [0, 0, 0], sizes = [1, 16, 128], strides = [1, 1, 1]} : vector<10x16x128xf32> to vector<1x16x128xf32>
    %26 = vector.broadcast %20 : f32 to vector<1x16x128xf32>
    %27 = arith.mulf %25, %26 : vector<1x16x128xf32>
    %28 = vector.extract_strided_slice %18 {offsets = [1, 0, 0], sizes = [8, 16, 128], strides = [1, 1, 1]} : vector<10x16x128xf32> to vector<8x16x128xf32>
    %29 = vector.extract_strided_slice %18 {offsets = [9, 0, 0], sizes = [1, 16, 128], strides = [1, 1, 1]} : vector<10x16x128xf32> to vector<1x16x128xf32>
    %30 = vector.broadcast %24 : f32 to vector<1x16x128xf32>
    %31 = arith.mulf %29, %30 : vector<1x16x128xf32>
    %32 = tpu.concatenate %27, %28, %31 in 0 : vector<1x16x128xf32>, vector<8x16x128xf32>, vector<1x16x128xf32> -> vector<10x16x128xf32>
    %33 = arith.truncf %32 : vector<10x16x128xf32> to vector<10x16x128xbf16>
    %cst_13 = arith.constant 0.000000e+00 : bf16
    %34 = vector.broadcast %cst_13 : bf16 to vector<8x1x128xbf16>
    %cst_14 = arith.constant 0.000000e+00 : f32
    %35 = vector.broadcast %cst_14 : f32 to vector<128x128xf32>
    %36 = vector.extract_strided_slice %33 {offsets = [0, 0, 0], sizes = [8, 16, 128], strides = [1, 1, 1]} : vector<10x16x128xbf16> to vector<8x16x128xbf16>
    %37 = vector.extract_strided_slice %36 {offsets = [0, 0, 0], sizes = [8, 15, 128], strides = [1, 1, 1]} : vector<8x16x128xbf16> to vector<8x15x128xbf16>
    %38 = tpu.concatenate %34, %37 in 1 : vector<8x1x128xbf16>, vector<8x15x128xbf16> -> vector<8x16x128xbf16>
    %39 = vector.extract_strided_slice %36 {offsets = [0, 1, 0], sizes = [8, 15, 128], strides = [1, 1, 1]} : vector<8x16x128xbf16> to vector<8x15x128xbf16>
    %40 = tpu.concatenate %39, %34 in 1 : vector<8x15x128xbf16>, vector<8x1x128xbf16> -> vector<8x16x128xbf16>
    %41 = tpu.concatenate %38, %36, %40 in 2 : vector<8x16x128xbf16>, vector<8x16x128xbf16>, vector<8x16x128xbf16> -> vector<8x16x384xbf16>
    %42 = vector.shape_cast %41 : vector<8x16x384xbf16> to vector<128x384xbf16>
    %c0_15 = arith.constant 0 : index
    %c0_16 = arith.constant 0 : index
    %c0_17 = arith.constant 0 : index
    %43 = vector.load %arg5[%c0_15, %c0_16, %c0_17] : memref<3x384x128xbf16, #tpu.memory_space<vmem>>, vector<1x384x128xbf16>
    %44 = vector.shape_cast %43 : vector<1x384x128xbf16> to vector<384x128xbf16>
    %cst_18 = arith.constant dense<0.000000e+00> : vector<128x128xf32>
    %45 = tpu.matmul %42, %44, %cst_18 {dimension_numbers = #tpu.dot_dimension_numbers<[1], [0], [0], [1], [0, 0, 1, 1], [], []>} : vector<128x384xbf16>, vector<384x128xbf16>, vector<128x128xf32> -> vector<128x128xf32>
    %46 = arith.addf %35, %45 : vector<128x128xf32>
    %47 = vector.extract_strided_slice %33 {offsets = [1, 0, 0], sizes = [8, 16, 128], strides = [1, 1, 1]} : vector<10x16x128xbf16> to vector<8x16x128xbf16>
    %48 = vector.extract_strided_slice %47 {offsets = [0, 0, 0], sizes = [8, 15, 128], strides = [1, 1, 1]} : vector<8x16x128xbf16> to vector<8x15x128xbf16>
    %49 = tpu.concatenate %34, %48 in 1 : vector<8x1x128xbf16>, vector<8x15x128xbf16> -> vector<8x16x128xbf16>
    %50 = vector.extract_strided_slice %47 {offsets = [0, 1, 0], sizes = [8, 15, 128], strides = [1, 1, 1]} : vector<8x16x128xbf16> to vector<8x15x128xbf16>
    %51 = tpu.concatenate %50, %34 in 1 : vector<8x15x128xbf16>, vector<8x1x128xbf16> -> vector<8x16x128xbf16>
    %52 = tpu.concatenate %49, %47, %51 in 2 : vector<8x16x128xbf16>, vector<8x16x128xbf16>, vector<8x16x128xbf16> -> vector<8x16x384xbf16>
    %53 = vector.shape_cast %52 : vector<8x16x384xbf16> to vector<128x384xbf16>
    %c1 = arith.constant 1 : index
    %c0_19 = arith.constant 0 : index
    %c0_20 = arith.constant 0 : index
    %54 = vector.load %arg5[%c1, %c0_19, %c0_20] : memref<3x384x128xbf16, #tpu.memory_space<vmem>>, vector<1x384x128xbf16>
    %55 = vector.shape_cast %54 : vector<1x384x128xbf16> to vector<384x128xbf16>
    %cst_21 = arith.constant dense<0.000000e+00> : vector<128x128xf32>
    %56 = tpu.matmul %53, %55, %cst_21 {dimension_numbers = #tpu.dot_dimension_numbers<[1], [0], [0], [1], [0, 0, 1, 1], [], []>} : vector<128x384xbf16>, vector<384x128xbf16>, vector<128x128xf32> -> vector<128x128xf32>
    %57 = arith.addf %46, %56 : vector<128x128xf32>
    %58 = vector.extract_strided_slice %33 {offsets = [2, 0, 0], sizes = [8, 16, 128], strides = [1, 1, 1]} : vector<10x16x128xbf16> to vector<8x16x128xbf16>
    %59 = vector.extract_strided_slice %58 {offsets = [0, 0, 0], sizes = [8, 15, 128], strides = [1, 1, 1]} : vector<8x16x128xbf16> to vector<8x15x128xbf16>
    %60 = tpu.concatenate %34, %59 in 1 : vector<8x1x128xbf16>, vector<8x15x128xbf16> -> vector<8x16x128xbf16>
    %61 = vector.extract_strided_slice %58 {offsets = [0, 1, 0], sizes = [8, 15, 128], strides = [1, 1, 1]} : vector<8x16x128xbf16> to vector<8x15x128xbf16>
    %62 = tpu.concatenate %61, %34 in 1 : vector<8x15x128xbf16>, vector<8x1x128xbf16> -> vector<8x16x128xbf16>
    %63 = tpu.concatenate %60, %58, %62 in 2 : vector<8x16x128xbf16>, vector<8x16x128xbf16>, vector<8x16x128xbf16> -> vector<8x16x384xbf16>
    %64 = vector.shape_cast %63 : vector<8x16x384xbf16> to vector<128x384xbf16>
    %c2 = arith.constant 2 : index
    %c0_22 = arith.constant 0 : index
    %c0_23 = arith.constant 0 : index
    %65 = vector.load %arg5[%c2, %c0_22, %c0_23] : memref<3x384x128xbf16, #tpu.memory_space<vmem>>, vector<1x384x128xbf16>
    %66 = vector.shape_cast %65 : vector<1x384x128xbf16> to vector<384x128xbf16>
    %cst_24 = arith.constant dense<0.000000e+00> : vector<128x128xf32>
    %67 = tpu.matmul %64, %66, %cst_24 {dimension_numbers = #tpu.dot_dimension_numbers<[1], [0], [0], [1], [0, 0, 1, 1], [], []>} : vector<128x384xbf16>, vector<384x128xbf16>, vector<128x128xf32> -> vector<128x128xf32>
    %68 = arith.addf %57, %67 : vector<128x128xf32>
    %c0_25 = arith.constant 0 : index
    %c0_26 = arith.constant 0 : index
    %69 = vector.load %arg6[%c0_25, %c0_26] : memref<1x128xf32, #tpu.memory_space<vmem>>, vector<1x128xf32>
    %70 = vector.broadcast %69 : vector<1x128xf32> to vector<128x128xf32>
    %71 = arith.addf %68, %70 : vector<128x128xf32>
    %cst_27 = arith.constant 0.000000e+00 : f32
    %72 = vector.broadcast %cst_27 : f32 to vector<128x128xf32>
    %73 = arith.maximumf %71, %72 : vector<128x128xf32>
    %74 = arith.truncf %73 : vector<128x128xf32> to vector<128x128xbf16>
    %c0_28 = arith.constant 0 : index
    %c0_29 = arith.constant 0 : index
    %75 = vector.load %arg7[%c0_28, %c0_29] : memref<128x128xbf16, #tpu.memory_space<vmem>>, vector<128x128xbf16>
    %cst_30 = arith.constant dense<0.000000e+00> : vector<128x128xf32>
    %76 = tpu.matmul %74, %75, %cst_30 {dimension_numbers = #tpu.dot_dimension_numbers<[1], [0], [0], [1], [0, 0, 1, 1], [], []>} : vector<128x128xbf16>, vector<128x128xbf16>, vector<128x128xf32> -> vector<128x128xf32>
    %c0_31 = arith.constant 0 : index
    %c0_32 = arith.constant 0 : index
    %77 = vector.load %arg8[%c0_31, %c0_32] : memref<1x128xf32, #tpu.memory_space<vmem>>, vector<1x128xf32>
    %78 = vector.broadcast %77 : vector<1x128xf32> to vector<128x128xf32>
    %79 = arith.addf %76, %78 : vector<128x128xf32>
    %cst_33 = arith.constant 0.000000e+00 : f32
    %80 = vector.broadcast %cst_33 : f32 to vector<128x128xf32>
    %81 = arith.maximumf %79, %80 : vector<128x128xf32>
    %82 = arith.addf %81, %16 : vector<128x128xf32>
    %83 = vector.shape_cast %82 : vector<128x128xf32> to vector<8x16x128xf32>
    %c0_34 = arith.constant 0 : index
    %c0_35 = arith.constant 0 : index
    %c0_36 = arith.constant 0 : index
    %c0_37 = arith.constant 0 : index
    %84 = vector.load %arg9[%c0_34, %c0_35, %c0_36, %c0_37] : memref<1x8x16x128xf32, #tpu.memory_space<vmem>>, vector<1x8x16x128xf32>
    %85 = vector.shape_cast %84 : vector<1x8x16x128xf32> to vector<8x16x128xf32>
    %86 = vector.shape_cast %83 : vector<8x16x128xf32> to vector<1x8x16x128xf32>
    tpu.vector_store %arg9[%c0_34, %c0_35, %c0_36, %c0_37], %86 {strides = array<i32>} : memref<1x8x16x128xf32, #tpu.memory_space<vmem>>, vector<1x8x16x128xf32>,
    return
  }
  func.func @transform_0(%arg0: i32, %arg1: i32) -> (i32, i32, i32, i32) {
    %c0_i32 = arith.constant 0 : i32
    %c0_i32_0 = arith.constant 0 : i32
    %c0_i32_1 = arith.constant 0 : i32
    %c0_i32_2 = arith.constant 0 : i32
    return %arg0, %c0_i32, %c0_i32_0, %c0_i32_1 : i32, i32, i32, i32
  }
  func.func @transform_1(%arg0: i32, %arg1: i32) -> (i32, i32) {
    %c0_i32 = arith.constant 0 : i32
    %c0_i32_0 = arith.constant 0 : i32
    %c0_i32_1 = arith.constant 0 : i32
    return %c0_i32, %c0_i32_0 : i32, i32
  }
  func.func @transform_2(%arg0: i32, %arg1: i32) -> (i32, i32) {
    %c0_i32 = arith.constant 0 : i32
    %c0_i32_0 = arith.constant 0 : i32
    %c0_i32_1 = arith.constant 0 : i32
    return %c0_i32, %c0_i32_0 : i32, i32
  }
  func.func @transform_3(%arg0: i32, %arg1: i32) -> (i32, i32, i32) {
    %c0_i32 = arith.constant 0 : i32
    %c0_i32_0 = arith.constant 0 : i32
    %c0_i32_1 = arith.constant 0 : i32
    %c0_i32_2 = arith.constant 0 : i32
    return %c0_i32, %c0_i32_0, %c0_i32_1 : i32, i32, i32
  }
  func.func @transform_4(%arg0: i32, %arg1: i32) -> (i32, i32) {
    %c0_i32 = arith.constant 0 : i32
    %c0_i32_0 = arith.constant 0 : i32
    %c0_i32_1 = arith.constant 0 : i32
    return %c0_i32, %c0_i32_0 : i32, i32
  }
  func.func @transform_5(%arg0: i32, %arg1: i32) -> (i32, i32) {
    %c0_i32 = arith.constant 0 : i32
    %c0_i32_0 = arith.constant 0 : i32
    %c0_i32_1 = arith.constant 0 : i32
    return %c0_i32, %c0_i32_0 : i32, i32
  }
  func.func @transform_6(%arg0: i32, %arg1: i32) -> (i32, i32) {
    %c0_i32 = arith.constant 0 : i32
    %c0_i32_0 = arith.constant 0 : i32
    %c0_i32_1 = arith.constant 0 : i32
    return %c0_i32, %c0_i32_0 : i32, i32
  }
  func.func @transform_7(%arg0: i32, %arg1: i32) -> (i32, i32, i32, i32) {
    %c0_i32 = arith.constant 0 : i32
    %c0_i32_0 = arith.constant 0 : i32
    %c0_i32_1 = arith.constant 0 : i32
    return %arg0, %arg1, %c0_i32, %c0_i32_0 : i32, i32, i32, i32
  }
}

</mosaic_0001>

<bundles_post_ra>
// kernel: tpu_custom_call.1
= control target key start
LH: loop header
LB: loop body
LE: loop exit
PB: predicated region body
PF: predicated region fallthrough
CT: control target
= control target key end

     0   :  { %s4516_s0 = inlined_call_operand.hbm [shape: bf16[2,18,16,128], index: 0, kind: input, shape index: {}]   ;;  %s4517_s1 = inlined_call_operand.hbm [shape: bf16[128,256], index: 1, kind: input, shape index: {}]   ;;  %s4518_s2 = inlined_call_operand.vmem [shape: f32[1,256], index: 2, kind: input, shape index: {}]   ;;  %s4519_s3 = inlined_call_operand.hbm [shape: bf16[3,384,128], index: 3, kind: input, shape index: {}]   ;;  %s4520_s4 = inlined_call_operand.vmem [shape: f32[1,128], index: 4, kind: input, shape index: {}]   ;;  %s4521_s5 = inlined_call_operand.hbm [shape: bf16[128,128], index: 5, kind: input, shape index: {}]   ;;  %s4522_s6 = inlined_call_operand.vmem [shape: f32[1,128], index: 6, kind: input, shape index: {}]   ;;  %s4523_s7 = inlined_call_operand.hbm [shape: f32[2,16,16,128], index: 7, kind: output, shape index: {}]  }
   0x1   :  { %4541 = sst [smem:[#allocation20_spill]] %s4517_s1 }
   0x2   :  { %4542 = sst [smem:[#allocation21_spill]] %s4519_s3 }
   0x3   :  { %4543 = sst [smem:[#allocation22_spill]] %s4521_s5 }
   0x4   :  { %4544 = sst [smem:[#allocation23_spill]] %s4522_s6 }
   0x5   :  { %4545 = sst [smem:[#allocation24_spill]] %s4523_s7 }
   0x6   :  { %12 = vsyncpa [#allocation3], 0 }
   0x7   :  { %14 = vsyncpa [#allocation3 + $0x1], 0 }
   0x8   :  { %15 = vsyncpa [#allocation6], 0 }
   0x9   :  { %16 = vsyncpa [#allocation9], 0 }
   0xa   :  { %17 = vsyncpa [#allocation4], 0 }
   0xb   :  { %19 = vsyncpa [#allocation4 + $0x1], 0  ;;  %s3631_s24 = smov 0   ;;  %s3633_s25 = smov 0  }
   0xc   :  { %s3635_s26 = smov 0   ;;  %s3637_s27 = smov 0  }
   0xd   :  { %s3639_s28 = smov 0   ;;  %s3641_s29 = smov 0  }
   0xe   :  { %s3643_s30 = smov 0   ;;  %s3645_s8 = smov 0  }
   0xf   :  { %s3647_s9 = smov 0   ;;  %s3649_s10 = smov 0  }
  0x10   :  { %s3651_s11 = smov 0  }
  0x11 LB: > { %4546 = sst [smem:[#allocation15_spill]] %s3537_s24  ;;  %s2445_s12 = sadd.s32 4294967295, %s3577_s11   ;;  %s3577_s11 = sphi %s3651_s11, %s25_s11   ;;  %s3573_s10 = sphi %s3649_s10, %s4594_s10   ;;  %s3569_s9 = sphi %s3647_s9, %s4593_s9   ;;  %s3565_s8 = sphi %s3645_s8, %s4592_s8   ;;  %s3561_s30 = sphi %s3643_s30, %s4591_s30   ;;  %s3557_s29 = sphi %s3641_s29, %s4590_s29   ;;  %s3553_s28 = sphi %s3639_s28, %s4589_s28   ;;  %s3549_s27 = sphi %s3637_s27, %s4588_s27   ;;  %s3545_s26 = sphi %s3635_s26, %s4587_s26   ;;  %s3541_s25 = sphi %s3633_s25, %s4586_s25   ;;  %s3537_s24 = sphi %s3631_s24, %s4585_s24  }
  0x12   : > { %4547 = sst [smem:[#allocation16_spill]] %s3541_s25  ;;  %s2446_s13 = sadd.s32 4294967294, %s3577_s11  }
  0x13   : > { %4548 = sst [smem:[#allocation17_spill]] %s3565_s8  ;;  %p57_p0 = scmp.ne.s32.totalorder %s3553_s28, %s3549_s27 }
  0x14   : > { %p3687_p1 = scmp.eq.s32.totalorder %s2445_s12, 0  ;;  %p208_p2 = scmp.ne.s32.totalorder %s3545_s26, %s3541_s25 }
  0x15   : > { %p209_p4 = scmp.eq.s32.totalorder %s2445_s12, 3  ;;  %p214_p5 = scmp.ne.s32.totalorder %s3541_s25, %s3537_s24 }
  0x16   : > { %s4549_s14 = scalar_select %p3687_p1, 1, 0 }
  0x17   : > { %p3696_p3 = por %p3687_p1, %p57_p0  ;;  %p215_p6 = scmp.eq.s32.totalorder %s2446_s13, 3 }
  0x18   : > { %p3702_p7 = por %p209_p4, %p208_p2  ;;  %p2447_p8 = scmp.ge.s32.totalorder %s3577_s11, 1 }
  0x19   : > { %s4550_s16 = scalar_select %p3696_p3, 1, 0 }
  0x1a   : > { %s4551_s17 = scalar_select %p3702_p7, 1, 0 }
  0x1b   : > { %p3707_p9 = por %p215_p6, %p214_p5  ;;  %p222_p10 = scmp.lt.s32.totalorder %s3577_s11, 5 }
  0x1c   : > { %4552 = sst [smem:[#allocation18_spill]] %s4551_s17  ;;  %s3579_s20 = smov [#allocation5]  }
  0x1d   : > { %s4553_s18 = scalar_select %p3707_p9, 1, 0 }
  0x1e   : > { %p3712_p11 = pnand %p2447_p8, %p222_p10  ;;  %s234_s21 = sshll.u32 %s3579_s20, 4  ;;  %s235_s21 = int_to_ptr.vmem [resolvable:$true] %s234_s21 }
  0x1f   : > { %4554 = sst [smem:[#allocation19_spill]] %s4553_s18  ;;  %s3580_s23 = smov [#allocation7]  }
  0x20   : > { %s4555_s19 = scalar_select %p3712_p11, 1, 0 }
  0x21   : > { %p3094_p12 = pneg %p3712_p11  ;;  %s250_s27 = sshll.u32 %s3580_s23, 4  ;;  %s3724_s27 = int_to_ptr.vmem [resolvable:$true] %s250_s27 }
  0x22   : > { %s4557_s1 = sld [smem:[#allocation20_spill]] }
  0x23   : > { %p3720_p13 = pnand %p3094_p12, %p3687_p1 }
  0x25   : > { %p3734_p2 = pneg %p3720_p13 }
  0x28   : > { %s3333_s15 = scalar_lea.hbm %s4557_s1, 2048 }
  0x29   : > { %p3334_p0 = scmp.ne.s32.totalorder %s4557_s1, %s3333_s15  ;;  %p3340_p6 = scmp.lt.u32.totalorder %s3333_s15, %s4557_s1 }
  0x2b   : > { %p3336_p4 = pnand %p3734_p2, %p3334_p0 }
  0x2d   : > { %p3337_p5 = pneg %p3336_p4 }
  0x2f   : > { %p3342_p8 = pnand %p3340_p6, %p3337_p5 }
  0x31   : > { %3345 = shalt.err (!%p3342_p8)
}
  0x32   : > { %s3346_s12 = scalar_lea.vmem %s235_s21, 2048  ;;  %p3354_p7 = scmp.lt.s32.totalorder %s235_s21, %s235_s21 }
  0x33   : > { %p3347_p10 = scmp.ne.s32.totalorder %s235_s21, %s3346_s12  ;;  %p3355_p1 = scmp.lt.s32.totalorder %s3346_s12, %s3346_s12 }
  0x35   : > { %p3349_p12 = pnand %p3347_p10, %p3734_p2  ;;  %p3356_p3 = por %p3355_p1, %p3354_p7 }
  0x37   : > { %p3350_p9 = pneg %p3349_p12 }
  0x39   : > { %p3357_p11 = pnand %p3356_p3, %p3350_p9 }
  0x3b   : > { %3360 = shalt.err (!%p3357_p11)
}
  0x3c   : > { %s3581_s24 = smov 128   ;;  %s3582_s18 = smov 8  }
  0x3d   : > { %3097 = dma.hbm_to_vmem [thread:$0]  (!%p3720_p13), %s4557_s1, 2048, %s235_s21, [#allocation6], %s3581_s24, %s3581_s24, %s3582_s18  }
  0x3e   : > { %s4559_s3 = sld [smem:[#allocation21_spill]] }
  0x44   : > { %s3361_s17 = scalar_lea.hbm %s4559_s3, 9216 }
  0x45   : > { %p3362_p0 = scmp.ne.s32.totalorder %s4559_s3, %s3361_s17  ;;  %p3368_p7 = scmp.lt.u32.totalorder %s3361_s17, %s4559_s3 }
  0x47   : > { %p3364_p1 = pnand %p3362_p0, %p3734_p2 }
  0x49   : > { %p3365_p3 = pneg %p3364_p1 }
  0x4b   : > { %p3370_p9 = pnand %p3368_p7, %p3365_p3 }
  0x4d   : > { %3373 = shalt.err (!%p3370_p9)
}
  0x4e   : > { %s3374_s21 = scalar_lea.vmem %s3724_s27, 9216  ;;  %p3382_p6 = scmp.lt.s32.totalorder %s3724_s27, %s3724_s27 }
  0x4f   : > { %p3375_p11 = scmp.ne.s32.totalorder %s3724_s27, %s3374_s21  ;;  %p3383_p8 = scmp.lt.s32.totalorder %s3374_s21, %s3374_s21 }
  0x51   : > { %p3377_p4 = pnand %p3375_p11, %p3734_p2  ;;  %p3384_p10 = por %p3383_p8, %p3382_p6 }
  0x53   : > { %p3378_p5 = pneg %p3377_p4 }
  0x55   : > { %p3385_p12 = pnand %p3384_p10, %p3378_p5 }
  0x57   : > { %3388 = shalt.err (!%p3385_p12)
}
  0x58   : > { %s4536_s6 = smov 64   ;;  %s4537_s25 = smov 4  }
  0x59   : > { %3100 = dma.hbm_to_vmem [thread:$0]  (!%p3720_p13), %s4559_s3, 9216, %s3724_s27, [#allocation6], %s4536_s6, %s4536_s6, %s4537_s25  }
  0x5a   : > { %s3585_s24 = smov [#allocation8]   ;;  %s4560_s5 = sld [smem:[#allocation22_spill]] }
  0x5b   : > { %s266_s18 = sshll.u32 %s3585_s24, 4  ;;  %s267_s18 = int_to_ptr.vmem [resolvable:$true] %s266_s18 }
  0x60   : > { %s3389_s13 = scalar_lea.hbm %s4560_s5, 1024 }
  0x61   : > { %p3390_p0 = scmp.ne.s32.totalorder %s4560_s5, %s3389_s13  ;;  %p3396_p7 = scmp.lt.u32.totalorder %s3389_s13, %s4560_s5 }
  0x63   : > { %p3392_p1 = pnand %p3390_p0, %p3734_p2 }
  0x65   : > { %p3393_p3 = pneg %p3392_p1 }
  0x67   : > { %p3398_p9 = pnand %p3396_p7, %p3393_p3 }
  0x69   : > { %3401 = shalt.err (!%p3398_p9)
}
  0x6a   : > { %s3402_s27 = scalar_lea.vmem %s267_s18, 1024  ;;  %p3410_p6 = scmp.lt.s32.totalorder %s267_s18, %s267_s18 }
  0x6b   : > { %p3403_p11 = scmp.ne.s32.totalorder %s267_s18, %s3402_s27  ;;  %p3411_p8 = scmp.lt.s32.totalorder %s3402_s27, %s3402_s27 }
  0x6d   : > { %p3405_p4 = pnand %p3403_p11, %p3734_p2  ;;  %p3412_p10 = por %p3411_p8, %p3410_p6 }
  0x6f   : > { %p3406_p5 = pneg %p3405_p4 }
  0x71   : > { %p3413_p12 = pnand %p3412_p10, %p3406_p5 }
  0x73   : > { %3416 = shalt.err (!%p3413_p12)
}
  0x74   : > { %3103 = dma.hbm_to_vmem [thread:$0]  (!%p3720_p13), %s4560_s5, 1024, %s267_s18, [#allocation9], %s4536_s6, %s4536_s6, %s4537_s25  }
  0x75   : > { %s34_s20 = sadd.s32 1, %s3569_s9  ;;  %s37_s22 = sadd.s32 1, %s3573_s10 }
  0x76   : > { %p35_p2 = scmp.ge.s32.totalorder %s34_s20, 2  ;;  %s44_s17 = sadd.s32 1, %s3557_s29 }
  0x77   : > { %p51_p0 = scmp.ne.s32.totalorder %s3557_s29, %s3553_s28  ;;  %p52_p1 = scmp.eq.s32.totalorder %s3577_s11, 0 }
  0x78   : > { %s4596_s20 = smov (%p35_p2, %s34_s20), 0  ;;  %s4598_s22 = smov (!%p35_p2, %s37_s22), %s3573_s10 }
  0x79   : > { %s194_s24 = ssub.s32 %s3569_s9, %s4596_s20  ;;  %p39_p3 = scmp.ge.s32.totalorder %s4598_s22, 2 }
  0x7a   : > { %p3115_p7 = scmp.lt.s32.totalorder %s3577_s11, 4  ;;  %p3809_p13 = por %p52_p1, %p51_p0 }
  0x7b   : > { %s283_s7 = sand.u32 1, %s3557_s29   ;;  %s4600_s22 = smov (%p39_p3, %s4598_s22), 0 }
  0x7c   : > { %s3075_s15 = smul.u32 144, %s283_s7  ;;  %s41_s13 = ssub.s32 %s3573_s10, %s4600_s22 }
  0x7d   : > { %s3076_s23 = smul.u32 2304, %s3573_s10  ;;  %p42_p9 = scmp.eq.s32.totalorder %s41_s13, 0 }
  0x7e   : > { %s195_s12 = sor.u32 %s194_s24, %s41_s13  ;;  %s4562_s27 = sadd.s32 1, %s3545_s26 }
  0x7f   : > { %p196_p11 = scmp.eq.s32.totalorder %s195_s12, 0  ;;  %s3830_s25 = scalar_lea.hbm %s4516_s0, %s3076_s23 }
  0x80   : > { %s3820_s21 = scalar_select %p42_p9, %s3557_s29, %s44_s17  }
  0x81   : > { %s3825_s1 = scalar_select %p196_p11, %s3545_s26, %s4562_s27  }
  0x82   : > { %s287_s3 = scalar_lea.vmem [#allocation2], %s3075_s15  ;;  %p3838_p4 = pnand %p3115_p7, %p3809_p13 }
  0x83   : > { %s294_s5 = sshll.u32 %s287_s3, 4  ;;  %s3842_s24 = scalar_lea.sflag [#allocation3], %s283_s7  ;;  %s3832_s5 = int_to_ptr.vmem [resolvable:$true] %s294_s5 }
  0x84   : > { %s3417_s6 = scalar_lea.hbm %s3830_s25, 2304  ;;  %p3419_p6 = pneg %p3838_p4 }
  0x85   : > { %p3418_p5 = scmp.ne.s32.totalorder %s3830_s25, %s3417_s6  ;;  %s3422_s18 = scalar_lea.hbm %s4516_s0, 4608 }
  0x86   : > { %p3423_p12 = scmp.lt.u32.totalorder %s3830_s25, %s4516_s0  ;;  %p3424_p2 = scmp.lt.u32.totalorder %s3422_s18, %s3417_s6 }
  0x87   : > { %p3420_p8 = pnand %p3419_p6, %p3418_p5  ;;  %p3426_p1 = scmp.lt.u32.totalorder %s3417_s6, %s3830_s25 }
  0x88   : > { %p3425_p0 = por %p3424_p2, %p3423_p12 }
  0x89   : > { %p3421_p10 = pneg %p3420_p8 }
  0x8a   : > { %p3427_p3 = por %p3426_p1, %p3425_p0 }
  0x8c   : > { %p3428_p7 = pnand %p3427_p3, %p3421_p10 }
  0x8e   : > { %3431 = shalt.err (!%p3428_p7)
}
  0x8f   : > { %s3432_s7 = scalar_lea.vmem %s3832_s5, 2304  ;;  %s3586_s12 = smov [#allocation2]  }
  0x90   : > { %p3433_p13 = scmp.ne.s32.totalorder %s3832_s5, %s3432_s7  ;;  %s3437_s27 = sshll.u32 %s3586_s12, 4  ;;  %s3438_s27 = int_to_ptr.vmem [resolvable:$false] %s3437_s27 }
  0x91   : > { %s3439_s8 = scalar_lea.vmem %s3438_s27, 4608  ;;  %p3440_p5 = scmp.lt.s32.totalorder %s3832_s5, %s3438_s27 }
  0x92   : > { %p3435_p9 = pnand %p3433_p13, %p3419_p6  ;;  %p3441_p8 = scmp.lt.s32.totalorder %s3439_s8, %s3432_s7 }
  0x94   : > { %p3436_p11 = pneg %p3435_p9  ;;  %p3442_p12 = por %p3441_p8, %p3440_p5 }
  0x96   : > { %p3443_p2 = pnand %p3442_p12, %p3436_p11 }
  0x98   : > { %3446 = shalt.err (!%p3443_p2)
}
  0x99   : > { %s4564_s6 = smov 4   ;;  %s4565_s3 = smov 64  }
  0x9a   : > { %3107 = dma.hbm_to_vmem [thread:$0]  (!%p3838_p4), %s3830_s25, 2304, %s3832_s5, %s3842_s24, %s4565_s3, %s4565_s3, %s4564_s6  }
  0x9b   : > { %p4566_p6 = scmp.ne.s32.totalorder %s4555_s19, 0 }
  0x9c   : > { %s308_s15 = sand.u32 (!%p4566_p6), 1, %s3553_s28   ;;  %p4567_p10 = scmp.ne.s32.totalorder (!%p4566_p6), %s4550_s16, 0 }
  0x9d   : > { %306 = sbr.rel (%p4566_p6) target bundleno = 1114 (0x45a), region = 48  ;;  %s309_s13 = scalar_lea.sflag (!%p4566_p6), [#allocation3], %s308_s15 }
  0x9e   : > { %s3077_s18 = smul.u32 (!%p4566_p6), 144, %s308_s15 }
  0xa0   : > { %s312_s23 = scalar_lea.vmem (!%p4566_p6), [#allocation2], %s3077_s18 }
  0xa4   : > { %3520 = dma.done.wait (%p4567_p10), %s309_s13, 2304  }
  0xa5   : > { %3522 = vsyncadd (%p4567_p10), %s309_s13, 4294964992  ;;  %p4568_p0 = scmp.ne.s32.totalorder %s4549_s14, 0 }
  0xa7   : > { %3524 = dma.done.wait (%p4568_p0), [#allocation6], 11264  }
  0xa8   : > { %3526 = vsyncadd (%p4568_p0), [#allocation6], 4294956032 }
  0xa9   : > { %3528 = dma.done.wait (%p4568_p0), [#allocation9], 1024  }
  0xaa   : > { %3530 = vsyncadd (%p4568_p0), [#allocation9], 4294966272  ;;  %v3587_v0 = vmov 0   ;;  %v3218_v1 = vld [vmem:[#allocation5 + $0x4] ss:$8 sps:$4 sm:$0xff]   ;;  %s2577_s5 = sshll.u32 %s3561_s30, 6  ;;  %v399_v45 = vlaneseq }
  0xab   : > { %581 = vmatprep.mubr.bf16.mxu0 %v3587_v0  ;;  %v3220_v2 = vld [vmem:[#allocation5] ss:$8 sps:$4 sm:$0xff]   ;;  %549 = vmatprep.subr.bf16.mxu0 %v3218_v1  ;;  %v3221_v3 = vld [vmem:[#allocation5 + $0x14] ss:$8 sps:$4 sm:$0xff]   ;;  %v3223_v4 = vld [vmem:[#allocation5 + $0x10] ss:$8 sps:$4 sm:$0xff]   ;;  %s3890_s16 = scalar_lea.vmem %s312_s23, %s2577_s5 [#allocation2] }
  0xac   : > { %550 = vmatpush1.bf16.msra.mxu0 %v3220_v2  ;;  %v3224_v5 = vld [vmem:[#allocation5 + $0x24] ss:$8 sps:$4 sm:$0xff]   ;;  %v3226_v6 = vld [vmem:[#allocation5 + $0x20] ss:$8 sps:$4 sm:$0xff]   ;;  %v3227_v7 = vld [vmem:[#allocation5 + $0x34] ss:$8 sps:$4 sm:$0xff]  }
  0xad   : > { %551 = vmatprep.subr.bf16.mxu0 %v3221_v3  ;;  %v3229_v8 = vld [vmem:[#allocation5 + $0x30] ss:$8 sps:$4 sm:$0xff]   ;;  %v3230_v9 = vld [vmem:[#allocation5 + $0x44] ss:$8 sps:$4 sm:$0xff]   ;;  %v3232_v10 = vld [vmem:[#allocation5 + $0x40] ss:$8 sps:$4 sm:$0xff]  }
  0xae   : > { %v3233_v11 = vld [vmem:[#allocation5 + $0x54] ss:$8 sps:$4 sm:$0xff]   ;;  %v3235_v12 = vld [vmem:[#allocation5 + $0x50] ss:$8 sps:$4 sm:$0xff]   ;;  %v3236_v13 = vld [vmem:[#allocation5 + $0x64] ss:$8 sps:$4 sm:$0xff]  }
  0xaf   : > { %v3238_v14 = vld [vmem:[#allocation5 + $0x60] ss:$8 sps:$4 sm:$0xff]   ;;  %v3239_v18 = vld [vmem:[#allocation5 + $0x74] ss:$8 sps:$4 sm:$0xff]   ;;  %v3241_v20 = vld [vmem:[#allocation5 + $0x70] ss:$8 sps:$4 sm:$0xff]  }
  0xb0   : > { %552 = vmatpush1.bf16.msra.mxu0 %v3223_v4  ;;  %v3252_v15 = vld [vmem:[#allocation7 + $0x100] sm:$0xff]   ;;  %v3254_v17 = vld [vmem:[#allocation7 + $0x108] sm:$0xff]   ;;  %v3244_v23 = vld [vmem:[%s3890_s16 + $0x10] sm:$0xff]   ;;  %v3914_v46 = vshrl.u32 %v399_v45, 7  ;;  %s2458_s14 = sshll.u32 %s3561_s30, 3  ;;  %vm799_vm0 = vcmask 1040384  }
  0xb1   : > { %553 = vmatprep.subr.bf16.mxu0 %v3224_v5  ;;  %v3253_v16 = vld [vmem:[#allocation7 + $0xc0] sm:$0xff]   ;;  %2963 = vmatprep.subr.bf16.mxu1 %v3252_v15  ;;  %v3255_v19 = vld [vmem:[#allocation7 + $0xc8] sm:$0xff]   ;;  %v3245_v24 = vld [vmem:[%s3890_s16 + $0x18] sm:$0xff]   ;;  %p714_p4 = scmp.ge.s32.totalorder %s2458_s14, 1  ;;  %vm800_vm1 = vsmask.f32 256 }
  0xb2   : > { %2971 = vmatpush3.bf16.msra.mxu1 %v3253_v16  ;;  %v3242_v21 = vld [vmem:[%s3890_s16] sm:$0xff]   ;;  %v3243_v22 = vld [vmem:[%s3890_s16 + $0x8] sm:$0xff]   ;;  %v3248_v27 = vld [vmem:[%s3890_s16 + $0x30] sm:$0xff]   ;;  %v401_v47 = vsub.s32 0, %v3914_v46  ;;  %s716_s24 = sadd.s32 9, %s2458_s14  ;;  %vm834_vm3 = vcmask 1047552  }
  0xb3   : > { %2964 = vmatprep.subr.bf16.mxu1 %v3254_v17  ;;  %v3246_v25 = vld [vmem:[%s3890_s16 + $0x20] sm:$0xff]   ;;  %v3247_v26 = vld [vmem:[%s3890_s16 + $0x28] sm:$0xff]   ;;  %v3249_v28 = vld [vmem:[%s3890_s16 + $0x38] sm:$0xff]   ;;  %s715_s17 = scalar_select %p714_p4, 1.0, 0.0 }
  0xb4   : > { %554 = vmatpush1.bf16.msra.mxu0 %v3226_v6  ;;  %v3250_v29 = vld [vmem:[%s3890_s16 + $0x40] sm:$0xff]   ;;  %v3251_v30 = vld [vmem:[%s3890_s16 + $0x48] sm:$0xff]   ;;  %v3256_v31 = vld [vmem:[#allocation7 + $0x110] sm:$0xff]   ;;  %p717_p1 = scmp.le.s32.totalorder %s716_s24, 16  ;;  %vm835_vm4 = vsmask.f32 7424 }
  0xb5   : > { %555 = vmatprep.subr.bf16.mxu0 %v3227_v7  ;;  %v3257_v32 = vld [vmem:[#allocation7 + $0xd0] sm:$0xff]   ;;  %v3258_v33 = vld [vmem:[#allocation7 + $0x118] sm:$0xff]   ;;  %v3260_v35 = vld [vmem:[#allocation7 + $0x120] sm:$0xff]   ;;  %v719_v57 = vstv %s715_s17  ;;  %s4576_s8 = sld [smem:[#allocation16_spill]]  ;;  %s4577_s23 = sld [smem:[#allocation23_spill]] }
  0xb6   : > { %2972 = vmatpush3.bf16.msra.mxu1 %v3255_v19  ;;  %v3259_v34 = vld [vmem:[#allocation7 + $0xd8] sm:$0xff]   ;;  %v3261_v36 = vld [vmem:[#allocation7 + $0xe0] sm:$0xff]   ;;  %v3262_v37 = vld [vmem:[#allocation7 + $0x128] sm:$0xff]   ;;  %s4089_s7 = scalar_select %p717_p1, 1.0, 0.0 }
  0xb7   : > { %2965 = vmatprep.subr.bf16.mxu1 %v3256_v31  ;;  %v3263_v38 = vld [vmem:[#allocation7 + $0xe8] sm:$0xff]   ;;  %v3264_v39 = vld [vmem:[#allocation7 + $0x130] sm:$0xff]   ;;  %v3266_v41 = vld [vmem:[#allocation7 + $0x138] sm:$0xff]   ;;  %s4578_s14 = sld [smem:[#allocation17_spill]]  ;;  %s2578_s19 = sshll.u32 %s3561_s30, 4 }
  0xb8   : > { %556 = vmatpush1.bf16.msra.mxu0 %v3229_v8  ;;  %v3265_v40 = vld [vmem:[#allocation7 + $0xf0] sm:$0xff]   ;;  %v3267_v42 = vld [vmem:[#allocation7 + $0xf8] sm:$0xff]   ;;  %v3268_v43 = vld [vmem:[#allocation7 + $0x40] sm:$0xff]   ;;  %s4580_s6 = sld [smem:[#allocation24_spill]] }
  0xb9   : > { %557 = vmatprep.subr.bf16.mxu0 %v3230_v9  ;;  %v3911_v44 = vld [vmem:[#allocation7 + $0x140] sm:$0xff]   ;;  %vm3950_vm2 = vmand %vm799_vm0, %vm800_vm1 }
  0xba   : > { %2973 = vmatpush3.bf16.msra.mxu1 %v3257_v32  ;;  %v397_v48 = vld [vmem:[%s4518_s2] sm:$0x3]  ;;  %vm4120_vm5 = vmand %vm834_vm3, %vm835_vm4 }
  0xbb   : > { %2966 = vmatprep.subr.bf16.mxu1 %v3258_v33  ;;  %v3923_v49 = vrot.slane %v397_v48, %v401_v47  ;;  %v3275_v47 = vld [vmem:[#allocation7 + $0x18] sm:$0xff]   ;;  %s352_s15 = sand.u32 1, %s4576_s8  }
  0xbc   : > { %558 = vmatpush1.bf16.msra.mxu0 %v3232_v10  ;;  %s2457_s5 = sshll.u32 %s352_s15, 7  ;;  %s4455_s18 = scalar_lea.sflag [#allocation4], %s352_s15 }
  0xbd   : > { %559 = vmatprep.subr.bf16.mxu0 %v3233_v11  ;;  %s4391_s16 = scalar_lea.vmem [#allocation10], %s2457_s5  ;;  %s2572_s25 = sshll.u32 %s4578_s14, 5 }
  0xbe   : > { %2974 = vmatpush3.bf16.msra.mxu1 %v3259_v34  ;;  %s2324_s30 = sadd.s32 %s2578_s19, %s2572_s25  ;;  %s2327_s24 = sshll.u32 %s4391_s16, 4  ;;  %s4448_s24 = int_to_ptr.vmem [resolvable:$true] %s2327_s24 }
  0xbf   : > { %2967 = vmatprep.subr.bf16.mxu1 %v3260_v35  ;;  %s2573_s17 = sshll.u32 %s2324_s30, 7  ;;  %s3447_s13 = scalar_lea.vmem %s4448_s24, 2048 }
  0xc0   : > { %560 = vmatpush1.bf16.msra.mxu0 %v3235_v12  ;;  %s4446_s3 = scalar_lea.hbm %s4580_s6, %s2573_s17  ;;  %p3448_p3 = scmp.ne.s32.totalorder %s4448_s24, %s3447_s13 }
  0xc1   : > { %561 = vmatprep.subr.bf16.mxu0 %v3236_v13 }
  0xc2   : > { %2975 = vmatpush3.bf16.msra.mxu1 %v3261_v36 }
  0xc3   : > { %2968 = vmatprep.subr.bf16.mxu1 %v3262_v37 }
  0xc4   : > { %562 = vmatpush1.bf16.msra.mxu0 %v3238_v14 }
  0xc5   : > { %563 = vmatprep.subr.bf16.mxu0 %v3239_v18 }
  0xc6   : > { %2976 = vmatpush3.bf16.msra.mxu1 %v3263_v38 }
  0xc7   : > { %2969 = vmatprep.subr.bf16.mxu1 %v3264_v39 }
  0xc8   : > { %564 = vmatpush1.bf16.msra.mxu0 %v3241_v20 }
  0xc9   : > { %2579 = vmatprep.subr.bf16.mxu0 %v3252_v15 }
  0xca   : > { %2977 = vmatpush3.bf16.msra.mxu1 %v3265_v40 }
  0xcb   : > { %582 = vmatmul.mubr.bf16.vlgmr.msra.gmra.mrb[0].mxu0 %v3242_v21  ;;  %2970 = vmatprep.subr.bf16.mxu1 %v3266_v41  ;;  %v3270_v21 = vld [vmem:[#allocation7 + $0x48] sm:$0xff]  }
  0xcc   : > { %589 = vmatprep.mubr.bf16.mxu0 %v3587_v0  ;;  %2580 = vmatpush3.bf16.msra.mxu0 %v3253_v16 }
  0xcd   : > { %2581 = vmatprep.subr.bf16.mxu0 %v3254_v17 }
  0xce   : > { %2978 = vmatpush3.bf16.msra.mxu1 %v3267_v42 }
  0xcf   : > { %2835 = vmatprep.subr.bf16.mxu1 %v3911_v44 }
  0xd0   : > { %2582 = vmatpush3.bf16.msra.mxu0 %v3255_v19  ;;  %v3269_v19 = vld [vmem:[#allocation7] sm:$0xff]  }
  0xd1   : > { %2583 = vmatprep.subr.bf16.mxu0 %v3256_v31 }
  0xd3   : > { %590 = vmatmul.mubr.bf16.gmra.mrb[4].mxu0 %v3243_v22 }
  0xd4   : > { %599 = vmatprep.mubr.bf16.mxu0 %v3587_v0  ;;  %2584 = vmatpush3.bf16.msra.mxu0 %v3257_v32 }
  0xd5   : > { %2585 = vmatprep.subr.bf16.mxu0 %v3258_v33 }
  0xd8   : > { %2586 = vmatpush3.bf16.msra.mxu0 %v3259_v34 }
  0xd9   : > { %2587 = vmatprep.subr.bf16.mxu0 %v3260_v35 }
  0xdb   : > { %600 = vmatmul.mubr.bf16.gmra.mrb[8].mxu0 %v3244_v23 }
  0xdc   : > { %609 = vmatprep.mubr.bf16.mxu0 %v3587_v0  ;;  %2588 = vmatpush3.bf16.msra.mxu0 %v3261_v36 }
  0xdd   : > { %2589 = vmatprep.subr.bf16.mxu0 %v3262_v37 }
  0xe0   : > { %2590 = vmatpush3.bf16.msra.mxu0 %v3263_v38  ;;  %v3273_v38 = vld [vmem:[#allocation7 + $0x10] sm:$0xff]  }
  0xe1   : > { %2591 = vmatprep.subr.bf16.mxu0 %v3264_v39  ;;  %v3274_v39 = vld [vmem:[#allocation7 + $0x58] sm:$0xff]  }
  0xe3   : > { %610 = vmatmul.mubr.bf16.gmra.mrb[12].mxu0 %v3245_v24 }
  0xe4   : > { %619 = vmatprep.mubr.bf16.mxu0 %v3587_v0  ;;  %2592 = vmatpush3.bf16.msra.mxu0 %v3265_v40 }
  0xe5   : > { %2593 = vmatprep.subr.bf16.mxu0 %v3266_v41 }
  0xe8   : > { %2594 = vmatpush3.bf16.msra.mxu0 %v3267_v42 }
  0xe9   : > { %2659 = vmatprep.subr.bf16.mxu0 %v3268_v43 }
  0xeb   : > { %620 = vmatmul.mubr.bf16.gmra.mrb[16].mxu0 %v3246_v25 }
  0xec   : > { %629 = vmatprep.mubr.bf16.mxu0 %v3587_v0 }
  0xf3   : > { %630 = vmatmul.mubr.bf16.gmra.mrb[20].mxu0 %v3247_v26 }
  0xf4   : > { %639 = vmatprep.mubr.bf16.mxu0 %v3587_v0 }
  0xfb   : > { %640 = vmatmul.mubr.bf16.gmra.mrb[24].mxu0 %v3248_v27  ;;  %v3271_v27 = vld [vmem:[#allocation7 + $0x8] sm:$0xff]  }
  0xfc   : > { %649 = vmatprep.mubr.bf16.mxu0 %v3587_v0 }
 0x103   : > { %650 = vmatmul.mubr.bf16.gmra.mrb[28].mxu0 %v3249_v28 }
 0x104   : > { %659 = vmatprep.mubr.bf16.mxu0 %v3587_v0 }
 0x10b   : > { %660 = vmatmul.mubr.bf16.gmra.mrb[32].mxu0 %v3250_v29 }
 0x10c   : > { %669 = vmatprep.mubr.bf16.mxu0 %v3587_v0 }
 0x113   : > { %670 = vmatmul.mubr.bf16.gmra.mrb[36].mxu0 %v3251_v30  ;;  %v3272_v30 = vld [vmem:[#allocation7 + $0x50] sm:$0xff]  }
 0x19e   : > { %v583_v50 = vpop.f32.mrb[0].mxu0 }
 0x19f   : > { %v584_v51 = vadd.f32 %v583_v50, %v3923_v49  ;;  %v585_v52 = vpop.f32.mrb[1].mxu0 }
 0x1a0   : > { %v586_v53 = vpop.f32.mrb[2].mxu0 }
 0x1a1   : > { %v678_v54 = vmax.f32 %v584_v51, 0.0  ;;  %v587_v55 = vadd.f32 %v586_v53, %v3923_v49  ;;  %v588_v56 = vpop.f32.mrb[3].mxu0  ;;  %v3276_v51 = vld [vmem:[#allocation7 + $0x60] sm:$0xff]  }
 0x1a3   : > { %v679_v58 = vmax.f32 %v587_v55, 0.0  ;;  %v720_v59 = vmul.f32 %v719_v57, %v678_v54 }
 0x1a5   : > { %v721_v60 = vmul.f32 %v719_v57, %v679_v58 }
 0x1a6   : > { %v591_v61 = vpop.f32.mrb[4].mxu0 }
 0x1a7   : > { %v592_v62 = vadd.f32 %v591_v61, %v3923_v49  ;;  %v3928_v63 = vpop.f32.mrb[5].mxu0  ;;  %v3930_v0 = vpack.c.bf16 %v721_v60, %v720_v59  ;;  %v3277_v59 = vld [vmem:[#allocation7 + $0x20] sm:$0xff]   ;;  %v3278_v60 = vld [vmem:[#allocation7 + $0x68] sm:$0xff]  }
 0x1a8   : > { %v595_v1 = vpop.f32.mrb[6].mxu0 }
 0x1a9   : > { %v596_v2 = vadd.f32 %v595_v1, %v3923_v49  ;;  %v3933_v3 = vpop.f32.mrb[7].mxu0  ;;  %v680_v4 = vmax.f32 %v592_v62, 0.0 }
 0x1ab   : > { %v682_v5 = vmax.f32 %v596_v2, 0.0 }
 0x1ad   : > { %v3935_v6 = vpack.c.bf16 %v682_v5, %v680_v4  ;;  %v3279_v5 = vld [vmem:[#allocation7 + $0x28] sm:$0xff]  }
 0x1ae   : > { %v601_v7 = vpop.f32.mrb[8].mxu0 }
 0x1af   : > { %v743_v8 = vshrl.u32 %v3935_v6, 16  ;;  %v602_v9 = vadd.f32 %v601_v7, %v3923_v49  ;;  %v3939_v10 = vpop.f32.mrb[9].mxu0  ;;  %1131 = vmatprep.mubr.bf16.mxu0 %v3935_v6  ;;  %v746_v15 = vshll.u32 %v3935_v6, 16 }
 0x1b0   : > { %v605_v11 = vpop.f32.mrb[10].mxu0 }
 0x1b1   : > { %v606_v12 = vadd.f32 %v605_v11, %v3923_v49  ;;  %v3943_v13 = vpop.f32.mrb[11].mxu0  ;;  %v745_v14 = vrot.slane %v743_v8, 7  ;;  %v684_v16 = vmax.f32 %v602_v9, 0.0  ;;  %v3280_v11 = vld [vmem:[#allocation7 + $0x70] sm:$0xff]  }
 0x1b3   : > { %v686_v17 = vmax.f32 %v606_v12, 0.0  ;;  %v748_v18 = vor.u32 %v746_v15, %v745_v14 }
 0x1b5   : > { %v3954_v22 = vpack.c.bf16 %v686_v17, %v684_v16  ;;  %v3958_v23 = vsel %vm3950_vm2, 0, %v748_v18  ;;  %v4538_v18 = vshrl.u32 %v3930_v0, 16 }
 0x1b6   : > { %v611_v24 = vpop.f32.mrb[12].mxu0  ;;  %1132 = vmatmul.mubr.bf16.vlgmr.msra.gmra.mrb[40].mxu0 %v3958_v23 }
 0x1b7   : > { %v612_v25 = vadd.f32 %v611_v24, %v3923_v49  ;;  %v3962_v26 = vpop.f32.mrb[13].mxu0  ;;  %1139 = vmatprep.mubr.bf16.mxu0 %v3954_v22  ;;  %2660 = vmatpush3.bf16.msra.mxu0 %v3269_v19  ;;  %v750_v28 = vshrl.u32 %v3954_v22, 16  ;;  %v753_v34 = vshll.u32 %v3954_v22, 16 }
 0x1b8   : > { %v615_v29 = vpop.f32.mrb[14].mxu0  ;;  %2661 = vmatprep.subr.bf16.mxu0 %v3270_v21 }
 0x1b9   : > { %v616_v31 = vadd.f32 %v615_v29, %v3923_v49  ;;  %v3967_v32 = vpop.f32.mrb[15].mxu0  ;;  %v752_v33 = vrot.slane %v750_v28, 7  ;;  %v688_v35 = vmax.f32 %v612_v25, 0.0  ;;  %v3281_v25 = vld [vmem:[#allocation7 + $0x30] sm:$0xff]  }
 0x1bb   : > { %v690_v36 = vmax.f32 %v616_v31, 0.0  ;;  %2662 = vmatpush3.bf16.msra.mxu0 %v3271_v27  ;;  %v755_v37 = vor.u32 %v753_v34, %v752_v33  ;;  %v3282_v27 = vld [vmem:[#allocation7 + $0x78] sm:$0xff]   ;;  %v738_v31 = vrot.slane %v4538_v18, 7 }
 0x1bc   : > { %2663 = vmatprep.subr.bf16.mxu0 %v3272_v30 }
 0x1bd   : > { %v3974_v40 = vpack.c.bf16 %v690_v36, %v688_v35  ;;  %v3978_v41 = vsel %vm3950_vm2, 0, %v755_v37  ;;  %v4539_v37 = vshll.u32 %v3930_v0, 16 }
 0x1be   : > { %v621_v42 = vpop.f32.mrb[16].mxu0  ;;  %1140 = vmatmul.mubr.bf16.gmra.mrb[44].mxu0 %v3978_v41 }
 0x1bf   : > { %v622_v43 = vadd.f32 %v621_v42, %v3923_v49  ;;  %v3982_v45 = vpop.f32.mrb[17].mxu0  ;;  %1147 = vmatprep.mubr.bf16.mxu0 %v3974_v40  ;;  %2664 = vmatpush3.bf16.msra.mxu0 %v3273_v38  ;;  %v757_v48 = vshrl.u32 %v3974_v40, 16  ;;  %v760_v55 = vshll.u32 %v3974_v40, 16  ;;  %v3283_v38 = vld [vmem:[#allocation7 + $0x38] sm:$0xff]  }
 0x1c0   : > { %v625_v50 = vpop.f32.mrb[18].mxu0  ;;  %2665 = vmatprep.subr.bf16.mxu0 %v3274_v39 }
 0x1c1   : > { %v626_v52 = vadd.f32 %v625_v50, %v3923_v49  ;;  %v3987_v53 = vpop.f32.mrb[19].mxu0  ;;  %v759_v54 = vrot.slane %v757_v48, 7  ;;  %v692_v56 = vmax.f32 %v622_v43, 0.0 }
 0x1c3   : > { %v694_v57 = vmax.f32 %v626_v52, 0.0  ;;  %2666 = vmatpush3.bf16.msra.mxu0 %v3275_v47  ;;  %v762_v58 = vor.u32 %v760_v55, %v759_v54  ;;  %v741_v52 = vor.u32 %v4539_v37, %v738_v31  ;;  %v3291_v37 = vld [vmem:[#allocation7 + $0x178] sm:$0xff]  }
 0x1c4   : > { %2667 = vmatprep.subr.bf16.mxu0 %v3276_v51 }
 0x1c5   : > { %v3994_v61 = vpack.c.bf16 %v694_v57, %v692_v56  ;;  %v3998_v62 = vsel %vm3950_vm2, 0, %v762_v58  ;;  %v3285_v58 = vld [vmem:[#allocation7 + $0x148] sm:$0xff]  }
 0x1c6   : > { %v631_v1 = vpop.f32.mrb[20].mxu0  ;;  %1148 = vmatmul.mubr.bf16.gmra.mrb[48].mxu0 %v3998_v62 }
 0x1c7   : > { %v632_v2 = vadd.f32 %v631_v1, %v3923_v49  ;;  %v4002_v4 = vpop.f32.mrb[21].mxu0  ;;  %1155 = vmatprep.mubr.bf16.mxu0 %v3994_v61  ;;  %2668 = vmatpush3.bf16.msra.mxu0 %v3277_v59  ;;  %v764_v7 = vshrl.u32 %v3994_v61, 16  ;;  %v767_v17 = vshll.u32 %v3994_v61, 16  ;;  %v802_v1 = vsel %vm3950_vm2, 0, %v741_v52 }
 0x1c8   : > { %v635_v9 = vpop.f32.mrb[22].mxu0  ;;  %2669 = vmatprep.subr.bf16.mxu0 %v3278_v60 }
 0x1c9   : > { %v636_v12 = vadd.f32 %v635_v9, %v3923_v49  ;;  %v4007_v14 = vpop.f32.mrb[23].mxu0  ;;  %v766_v16 = vrot.slane %v764_v7, 7  ;;  %v696_v19 = vmax.f32 %v632_v2, 0.0 }
 0x1cb   : > { %v698_v21 = vmax.f32 %v636_v12, 0.0  ;;  %2670 = vmatpush3.bf16.msra.mxu0 %v3279_v5  ;;  %v769_v24 = vor.u32 %v767_v17, %v766_v16  ;;  %v3286_v16 = vld [vmem:[#allocation7 + $0x150] sm:$0xff]  }
 0x1cc   : > { %2671 = vmatprep.subr.bf16.mxu0 %v3280_v11 }
 0x1cd   : > { %v4015_v29 = vpack.c.bf16 %v698_v21, %v696_v19  ;;  %v4019_v30 = vsel %vm3950_vm2, 0, %v769_v24 }
 0x1ce   : > { %v641_v33 = vpop.f32.mrb[24].mxu0  ;;  %1156 = vmatmul.mubr.bf16.gmra.mrb[52].mxu0 %v4019_v30 }
 0x1cf   : > { %v642_v35 = vadd.f32 %v641_v33, %v3923_v49  ;;  %v4025_v36 = vpop.f32.mrb[25].mxu0  ;;  %1163 = vmatprep.mubr.bf16.mxu1 %v4015_v29  ;;  %2672 = vmatpush3.bf16.msra.mxu0 %v3281_v25  ;;  %v771_v39 = vshrl.u32 %v4015_v29, 16  ;;  %v774_v51 = vshll.u32 %v4015_v29, 16  ;;  %v3287_v33 = vld [vmem:[#allocation7 + $0x158] sm:$0xff]  }
 0x1d0   : > { %1469 = vmatprep.mubr.bf16.mxu0 %v3930_v0  ;;  %v645_v42 = vpop.f32.mrb[26].mxu0  ;;  %2673 = vmatprep.subr.bf16.mxu0 %v3282_v27 }
 0x1d1   : > { %v646_v43 = vadd.f32 %v645_v42, %v3923_v49  ;;  %v4032_v47 = vpop.f32.mrb[27].mxu0  ;;  %v773_v50 = vrot.slane %v771_v39, 7  ;;  %v700_v54 = vmax.f32 %v642_v35, 0.0 }
 0x1d3   : > { %v702_v56 = vmax.f32 %v646_v43, 0.0  ;;  %2674 = vmatpush3.bf16.msra.mxu0 %v3283_v38  ;;  %v776_v57 = vor.u32 %v774_v51, %v773_v50 }
 0x1d5   : > { %v4041_v59 = vpack.c.bf16 %v702_v56, %v700_v54  ;;  %v4045_v60 = vsel %vm3950_vm2, 0, %v776_v57  ;;  %v3288_v56 = vld [vmem:[#allocation7 + $0x160] sm:$0xff]  }
 0x1d6   : > { %v651_v2 = vpop.f32.mrb[28].mxu0  ;;  %1164 = vmatmul.mubr.bf16.vlgmr.msra.gmra.mrb[0].mxu1 %v4045_v60  ;;  %1470 = vmatmul.mubr.bf16.vlgmr.msra.gmra.mrb[56].mxu0 %v802_v1 }
 0x1d7   : > { %v652_v5 = vadd.f32 %v651_v2, %v3923_v49  ;;  %2836 = vmatpush3.bf16.msra.mxu1 %v3911_v44  ;;  %v4052_v9 = vpop.f32.mrb[29].mxu0  ;;  %1171 = vmatprep.mubr.bf16.mxu1 %v4041_v59  ;;  %v778_v11 = vshrl.u32 %v4041_v59, 16  ;;  %v781_v44 = vshll.u32 %v4041_v59, 16 }
 0x1d8   : > { %1477 = vmatprep.mubr.bf16.mxu0 %v3935_v6  ;;  %v655_v12 = vpop.f32.mrb[30].mxu0  ;;  %2837 = vmatprep.subr.bf16.mxu1 %v3285_v58 }
 0x1d9   : > { %v656_v19 = vadd.f32 %v655_v12, %v3923_v49  ;;  %v4058_v21 = vpop.f32.mrb[31].mxu0  ;;  %v780_v24 = vrot.slane %v778_v11, 7  ;;  %v704_v25 = vmax.f32 %v652_v5, 0.0 }
 0x1db   : > { %v706_v27 = vmax.f32 %v656_v19, 0.0  ;;  %2838 = vmatpush3.bf16.msra.mxu1 %v3285_v58  ;;  %v783_v31 = vor.u32 %v781_v44, %v780_v24 }
 0x1dc   : > { %2839 = vmatprep.subr.bf16.mxu1 %v3286_v16 }
 0x1dd   : > { %v4065_v35 = vpack.c.bf16 %v706_v27, %v704_v25  ;;  %v4069_v38 = vsel %vm3950_vm2, 0, %v783_v31  ;;  %v812_v25 = vrot.slane %v746_v15, 1 }
 0x1de   : > { %v661_v42 = vpop.f32.mrb[32].mxu0  ;;  %1172 = vmatmul.mubr.bf16.gmra.mrb[4].mxu1 %v4069_v38  ;;  %1478 = vmatmul.mubr.bf16.gmra.mrb[60].mxu0 %v3958_v23 }
 0x1df   : > { %v662_v43 = vadd.f32 %v661_v42, %v3923_v49  ;;  %2840 = vmatpush3.bf16.msra.mxu1 %v3286_v16  ;;  %v4076_v50 = vpop.f32.mrb[33].mxu0  ;;  %1179 = vmatprep.mubr.bf16.mxu1 %v4065_v35  ;;  %v785_v52 = vshrl.u32 %v4065_v35, 16  ;;  %v788_v1 = vshll.u32 %v4065_v35, 16  ;;  %v3289_v16 = vld [vmem:[#allocation7 + $0x168] sm:$0xff]  }
 0x1e0   : > { %1485 = vmatprep.mubr.bf16.mxu0 %v3954_v22  ;;  %v665_v54 = vpop.f32.mrb[34].mxu0  ;;  %2841 = vmatprep.subr.bf16.mxu1 %v3287_v33 }
 0x1e1   : > { %v666_v57 = vadd.f32 %v665_v54, %v3923_v49  ;;  %v4082_v58 = vpop.f32.mrb[35].mxu0  ;;  %v787_v23 = vrot.slane %v785_v52, 7  ;;  %v708_v2 = vmax.f32 %v662_v43, 0.0  ;;  %v3290_v43 = vld [vmem:[#allocation7 + $0x170] sm:$0xff]   ;;  %v722_v54 = vstv %s4089_s7  ;;  %s4579_s7 = sld [smem:[#allocation18_spill]] }
 0x1e3   : > { %v710_v5 = vmax.f32 %v666_v57, 0.0  ;;  %2842 = vmatpush3.bf16.msra.mxu1 %v3287_v33  ;;  %v790_v12 = vor.u32 %v788_v1, %v787_v23 }
 0x1e4   : > { %2843 = vmatprep.subr.bf16.mxu1 %v3288_v56 }
 0x1e5   : > { %v4091_v19 = vpack.c.bf16 %v710_v5, %v708_v2  ;;  %v4095_v24 = vsel %vm3950_vm2, 0, %v790_v12  ;;  %v813_v12 = vor.u32 %v812_v25, %v743_v8 }
 0x1e6   : > { %1180 = vmatmul.mubr.bf16.gmra.mrb[8].mxu1 %v4095_v24  ;;  %1486 = vmatmul.mubr.bf16.gmra.mrb[64].mxu0 %v3978_v41  ;;  %v671_v27 = vpop.f32.mrb[36].mxu0 }
 0x1e7   : > { %2844 = vmatpush3.bf16.msra.mxu1 %v3288_v56  ;;  %1187 = vmatprep.mubr.bf16.mxu1 %v4091_v19  ;;  %v4540_v31 = vshrl.u32 %v4091_v19, 16  ;;  %v672_v33 = vadd.f32 %v671_v27, %v3923_v49  ;;  %v673_v42 = vpop.f32.mrb[37].mxu0  ;;  %v897_v15 = vshll.u32 %v4091_v19, 16  ;;  %p4581_p7 = scmp.ne.s32.totalorder %s4579_s7, 0 }
 0x1e8   : > { %1493 = vmatprep.mubr.bf16.mxu0 %v3974_v40  ;;  %2845 = vmatprep.subr.bf16.mxu1 %v3289_v16  ;;  %v674_v57 = vpop.f32.mrb[38].mxu0 }
 0x1e9   : > { %v896_v23 = vrot.slane %v4540_v31, 7  ;;  %v712_v2 = vmax.f32 %v672_v33, 0.0  ;;  %v675_v56 = vadd.f32 %v674_v57, %v3923_v49  ;;  %v676_v5 = vpop.f32.mrb[39].mxu0  ;;  %v814_v31 = vrot.slane %v753_v34, 1  ;;  %v3293_v57 = vld [vmem:[#allocation7 + $0x88] sm:$0xff]   ;;  %p3449_p13 = pnand %p3448_p3, %p4581_p7 }
 0x1ea   : > { %v816_v34 = vrot.slane %v760_v55, 1 }
 0x1eb   : > { %2846 = vmatpush3.bf16.msra.mxu1 %v3289_v16  ;;  %v899_v27 = vor.u32 %v897_v15, %v896_v23  ;;  %v723_v42 = vmul.f32 %v722_v54, %v712_v2  ;;  %v713_v18 = vmax.f32 %v675_v56, 0.0  ;;  %v4128_v16 = vsel %vm4120_vm5, %v813_v12, 0  ;;  %v3295_v23 = vld [vmem:[#allocation7 + $0x98] sm:$0xff]   ;;  %v3296_v56 = vld [vmem:[#allocation7 + $0xa0] sm:$0xff]   ;;  %v3297_v12 = vld [vmem:[#allocation7 + $0xa8] sm:$0xff]   ;;  %p3450_p9 = pneg %p3449_p13 }
 0x1ec   : > { %2847 = vmatprep.subr.bf16.mxu1 %v3290_v43  ;;  %v815_v33 = vor.u32 %v814_v31, %v750_v28 }
 0x1ed   : > { %v4118_v49 = vsel %vm3950_vm2, 0, %v899_v27  ;;  %v724_v8 = vmul.f32 %v722_v54, %v713_v18  ;;  %v3292_v18 = vld [vmem:[#allocation7 + $0x80] sm:$0xff]   ;;  %v817_v54 = vor.u32 %v816_v34, %v757_v48  ;;  %v820_v48 = vrot.slane %v774_v51, 1 }
 0x1ee   : > { %1188 = vmatmul.mubr.bf16.gmra.mrb[12].mxu1 %v4118_v49  ;;  %1494 = vmatmul.mubr.bf16.gmra.mrb[68].mxu0 %v3998_v62  ;;  %v4142_v55 = vsel %vm4120_vm5, %v815_v33, 0  ;;  %v822_v51 = vrot.slane %v781_v44, 1 }
 0x1ef   : > { %2848 = vmatpush3.bf16.msra.mxu1 %v3290_v43  ;;  %2851 = vmatprep.mubr.bf16.mxu1 %v4128_v16  ;;  %v4133_v25 = vpack.c.bf16 %v724_v8, %v723_v42  ;;  %v818_v43 = vrot.slane %v767_v17, 1  ;;  %v4150_v28 = vsel %vm4120_vm5, %v817_v54, 0  ;;  %v821_v31 = vor.u32 %v820_v48, %v771_v39  ;;  %v3298_v8 = vld [vmem:[#allocation7 + $0xb0] sm:$0xff]   ;;  %v3299_v54 = vld [vmem:[#allocation7 + $0xb8] sm:$0xff]   ;;  %v3300_v48 = vld [vmem:[#allocation7 + $0x1c0] sm:$0xff]  }
 0x1f0   : > { %1501 = vmatprep.mubr.bf16.mxu0 %v3994_v61  ;;  %2849 = vmatprep.subr.bf16.mxu1 %v3291_v37  ;;  %v824_v39 = vrot.slane %v788_v1, 1  ;;  %v823_v44 = vor.u32 %v822_v51, %v778_v11  ;;  %v902_v1 = vrot.slane %v897_v15, 1  ;;  %v4574_v15 = vshrl.u32 %v4091_v19, 16  ;;  %v3306_v51 = vld [vmem:[#allocation7 + $0x1d8] sm:$0xff]  }
 0x1f1   : > { %v819_v17 = vor.u32 %v818_v43, %v764_v7  ;;  %v4170_v7 = vsel %vm4120_vm5, %v821_v31, 0  ;;  %v3304_v31 = vld [vmem:[#allocation7 + $0x1d0] sm:$0xff]  }
 0x1f2   : > { %v825_v5 = vor.u32 %v824_v39, %v785_v52  ;;  %v4182_v27 = vsel %vm4120_vm5, %v823_v44, 0  ;;  %v4573_v52 = vshll.u32 %v3930_v0, 16  ;;  %v903_v34 = vor.u32 %v902_v1, %v4574_v15  ;;  %v3307_v39 = vld [vmem:[#allocation7 + $0x198] sm:$0xff]   ;;  %v3310_v44 = vld [vmem:[#allocation7 + $0x1e8] sm:$0xff]   ;;  %v3313_v1 = vld [vmem:[#allocation7 + $0x1b0] sm:$0xff]  }
 0x1f3   : > { %2850 = vmatpush3.bf16.msra.mxu1 %v3291_v37  ;;  %v3294_v37 = vld [vmem:[#allocation7 + $0x90] sm:$0xff]   ;;  %v4162_v2 = vsel %vm4120_vm5, %v819_v17, 0  ;;  %v3303_v17 = vld [vmem:[#allocation7 + $0x188] sm:$0xff]  }
 0x1f4   : > { %2867 = vmatprep.subr.bf16.mxu1 %v3292_v18  ;;  %v4190_v11 = vsel %vm4120_vm5, %v825_v5, 0  ;;  %v810_v42 = vrot.slane %v4573_v52, 1  ;;  %v3311_v5 = vld [vmem:[#allocation7 + $0x1a8] sm:$0xff]   ;;  %v3314_v52 = vld [vmem:[#allocation7 + $0x1f8] sm:$0xff]  }
 0x1f5   : > { %v3317_v15 = vld [vmem:[#allocation7 + $0x208] sm:$0xff]  }
 0x1f6   : > { %2852 = vmatmul.mubr.bf16.vlgmr.msra.gmra.mrb[16].mxu1 %v4142_v55  ;;  %1502 = vmatmul.mubr.bf16.gmra.mrb[72].mxu0 %v4019_v30 }
 0x1f7   : > { %2868 = vmatpush3.bf16.msra.mxu1 %v3292_v18  ;;  %2855 = vmatprep.mubr.bf16.mxu1 %v4150_v28  ;;  %v4575_v18 = vshrl.u32 %v3930_v0, 16  ;;  %v3301_v0 = vld [vmem:[#allocation7 + $0x180] sm:$0xff]  }
 0x1f8   : > { %1509 = vmatprep.mubr.bf16.mxu0 %v4015_v29  ;;  %2869 = vmatprep.subr.bf16.mxu1 %v3293_v57 }
 0x1f9   : > { %v811_v33 = vor.u32 %v810_v42, %v4575_v18  ;;  %v3315_v42 = vld [vmem:[#allocation7 + $0x1b8] sm:$0xff]  }
 0x1fa   : > { %v3319_v18 = vld [vmem:[#allocation7 + $0x218] sm:$0xff]  }
 0x1fb   : > { %2870 = vmatpush3.bf16.msra.mxu1 %v3293_v57  ;;  %v4202_v57 = vsel %vm4120_vm5, %v903_v34, 0  ;;  %v837_v43 = vsel %vm4120_vm5, %v811_v33, 0  ;;  %v3318_v34 = vld [vmem:[#allocation7 + $0x210] sm:$0xff]   ;;  %v3321_v33 = vld [vmem:[#allocation7 + $0x228] sm:$0xff]  }
 0x1fc   : > { %2871 = vmatprep.subr.bf16.mxu1 %v3294_v37 }
 0x1fe   : > { %2856 = vmatmul.mubr.bf16.gmra.mrb[20].mxu1 %v4162_v2  ;;  %1510 = vmatmul.mubr.bf16.gmra.mrb[76].mxu0 %v4045_v60 }
 0x1ff   : > { %2872 = vmatpush3.bf16.msra.mxu1 %v3294_v37  ;;  %2859 = vmatprep.mubr.bf16.mxu1 %v4170_v7  ;;  %v3302_v37 = vld [vmem:[#allocation7 + $0x1c8] sm:$0xff]  }
 0x200   : > { %1517 = vmatprep.mubr.bf16.mxu0 %v4041_v59  ;;  %2873 = vmatprep.subr.bf16.mxu1 %v3295_v23 }
 0x203   : > { %2874 = vmatpush3.bf16.msra.mxu1 %v3295_v23  ;;  %v3305_v23 = vld [vmem:[#allocation7 + $0x190] sm:$0xff]  }
 0x204   : > { %2875 = vmatprep.subr.bf16.mxu1 %v3296_v56 }
 0x206   : > { %2860 = vmatmul.mubr.bf16.gmra.mrb[24].mxu1 %v4182_v27  ;;  %1518 = vmatmul.mubr.bf16.gmra.mrb[80].mxu0 %v4069_v38 }
 0x207   : > { %2876 = vmatpush3.bf16.msra.mxu1 %v3296_v56  ;;  %2863 = vmatprep.mubr.bf16.mxu1 %v4190_v11  ;;  %v3308_v56 = vld [vmem:[#allocation7 + $0x1e0] sm:$0xff]  }
 0x208   : > { %1525 = vmatprep.mubr.bf16.mxu0 %v4065_v35  ;;  %2877 = vmatprep.subr.bf16.mxu1 %v3297_v12 }
 0x20b   : > { %2878 = vmatpush3.bf16.msra.mxu1 %v3297_v12  ;;  %v3312_v12 = vld [vmem:[#allocation7 + $0x1f0] sm:$0xff]  }
 0x20c   : > { %2879 = vmatprep.subr.bf16.mxu1 %v3298_v8 }
 0x20e   : > { %2864 = vmatmul.mubr.bf16.gmra.mrb[28].mxu1 %v4202_v57  ;;  %1526 = vmatmul.mubr.bf16.gmra.mrb[84].mxu0 %v4095_v24 }
 0x20f   : > { %2880 = vmatpush3.bf16.msra.mxu1 %v3298_v8  ;;  %2883 = vmatprep.mubr.bf16.mxu1 %v837_v43  ;;  %v3316_v8 = vld [vmem:[#allocation7 + $0x200] sm:$0xff]  }
 0x210   : > { %2881 = vmatprep.subr.bf16.mxu1 %v3299_v54 }
 0x213   : > { %2882 = vmatpush3.bf16.msra.mxu1 %v3299_v54 }
 0x214   : > { %2739 = vmatprep.subr.bf16.mxu1 %v3300_v48 }
 0x216   : > { %2884 = vmatmul.mubr.bf16.vlgmr.msra.gmra.mrb[16].mxu1 %v4128_v16  ;;  %v3309_v16 = vld [vmem:[#allocation7 + $0x1a0] sm:$0xff]  }
 0x217   : > { %2740 = vmatpush3.bf16.msra.mxu1 %v3301_v0  ;;  %2887 = vmatprep.mubr.bf16.mxu1 %v4142_v55 }
 0x218   : > { %2741 = vmatprep.subr.bf16.mxu1 %v3302_v37 }
 0x21b   : > { %2742 = vmatpush3.bf16.msra.mxu1 %v3303_v17 }
 0x21c   : > { %2743 = vmatprep.subr.bf16.mxu1 %v3304_v31  ;;  %v3324_v31 = vld [vmem:[#allocation8] sm:$0xff]  }
 0x21d   : > { %2931 = vmatprep.subr.bf16.mxu0 %v3324_v31 }
 0x21e   : > { %2888 = vmatmul.mubr.bf16.gmra.mrb[20].mxu1 %v4150_v28  ;;  %2932 = vmatpush3.bf16.msra.mxu0 %v3324_v31 }
 0x21f   : > { %2744 = vmatpush3.bf16.msra.mxu1 %v3305_v23  ;;  %2891 = vmatprep.mubr.bf16.mxu1 %v4162_v2 }
 0x220   : > { %2745 = vmatprep.subr.bf16.mxu1 %v3306_v51 }
 0x223   : > { %2746 = vmatpush3.bf16.msra.mxu1 %v3307_v39 }
 0x224   : > { %2747 = vmatprep.subr.bf16.mxu1 %v3308_v56 }
 0x226   : > { %2892 = vmatmul.mubr.bf16.gmra.mrb[24].mxu1 %v4170_v7 }
 0x227   : > { %2748 = vmatpush3.bf16.msra.mxu1 %v3309_v16  ;;  %2895 = vmatprep.mubr.bf16.mxu1 %v4182_v27 }
 0x228   : > { %2749 = vmatprep.subr.bf16.mxu1 %v3310_v44  ;;  %v3325_v44 = vld [vmem:[#allocation8 + $0x8] sm:$0xff]  }
 0x229   : > { %2933 = vmatprep.subr.bf16.mxu0 %v3325_v44 }
 0x22a   : > { %2934 = vmatpush3.bf16.msra.mxu0 %v3325_v44 }
 0x22b   : > { %2750 = vmatpush3.bf16.msra.mxu1 %v3311_v5 }
 0x22c   : > { %2751 = vmatprep.subr.bf16.mxu1 %v3312_v12 }
 0x22e   : > { %2896 = vmatmul.mubr.bf16.gmra.mrb[28].mxu1 %v4190_v11 }
 0x22f   : > { %2752 = vmatpush3.bf16.msra.mxu1 %v3313_v1  ;;  %1869 = vmatprep.mubr.bf16.mxu1 %v3954_v22  ;;  %v3320_v22 = vld [vmem:[#allocation7 + $0x220] sm:$0xff]  }
 0x230   : > { %2753 = vmatprep.subr.bf16.mxu1 %v3314_v52 }
 0x233   : > { %2754 = vmatpush3.bf16.msra.mxu1 %v3315_v42 }
 0x234   : > { %2899 = vmatprep.subr.bf16.mxu1 %v3316_v8 }
 0x236   : > { %1870 = vmatmul.mubr.bf16.vlgmr.msra.gmra.mrb[32].mxu1 %v3978_v41  ;;  %v3323_v41 = vld [vmem:[#allocation7 + $0x238] sm:$0xff]  }
 0x237   : > { %2900 = vmatpush3.bf16.msra.mxu1 %v3316_v8  ;;  %1877 = vmatprep.mubr.bf16.mxu1 %v3974_v40  ;;  %v3322_v40 = vld [vmem:[#allocation7 + $0x230] sm:$0xff]  }
 0x238   : > { %2901 = vmatprep.subr.bf16.mxu1 %v3317_v15 }
 0x23b   : > { %2902 = vmatpush3.bf16.msra.mxu1 %v3317_v15 }
 0x23c   : > { %2903 = vmatprep.subr.bf16.mxu1 %v3318_v34 }
 0x23e   : > { %1878 = vmatmul.mubr.bf16.gmra.mrb[36].mxu1 %v3998_v62 }
 0x23f   : > { %1885 = vmatprep.mubr.bf16.mxu1 %v3994_v61  ;;  %2904 = vmatpush3.bf16.msra.mxu1 %v3318_v34  ;;  %v1632_v61 = vshrl.u32 %v4133_v25, 16 }
 0x240   : > { %2905 = vmatprep.subr.bf16.mxu1 %v3319_v18 }
 0x241   : > { %v1634_v62 = vrot.slane %v1632_v61, 7 }
 0x243   : > { %2906 = vmatpush3.bf16.msra.mxu1 %v3319_v18 }
 0x244   : > { %2907 = vmatprep.subr.bf16.mxu1 %v3320_v22 }
 0x246   : > { %1886 = vmatmul.mubr.bf16.gmra.mrb[40].mxu1 %v4019_v30 }
 0x247   : > { %1893 = vmatprep.mubr.bf16.mxu1 %v4015_v29  ;;  %2908 = vmatpush3.bf16.msra.mxu1 %v3320_v22  ;;  %v1635_v29 = vshll.u32 %v4133_v25, 16 }
 0x248   : > { %2909 = vmatprep.subr.bf16.mxu1 %v3321_v33 }
 0x249   : > { %v1637_v30 = vor.u32 %v1635_v29, %v1634_v62 }
 0x24b   : > { %2910 = vmatpush3.bf16.msra.mxu1 %v3321_v33 }
 0x24c   : > { %2911 = vmatprep.subr.bf16.mxu1 %v3322_v40 }
 0x24e   : > { %1894 = vmatmul.mubr.bf16.gmra.mrb[44].mxu1 %v4045_v60  ;;  %v1640_v60 = vrot.slane %v1635_v29, 1 }
 0x24f   : > { %1901 = vmatprep.mubr.bf16.mxu1 %v4041_v59  ;;  %2912 = vmatpush3.bf16.msra.mxu1 %v3322_v40  ;;  %v1639_v59 = vsel %vm3950_vm2, 0, %v1637_v30 }
 0x250   : > { %2913 = vmatprep.subr.bf16.mxu1 %v3323_v41 }
 0x253   : > { %2914 = vmatpush3.bf16.msra.mxu1 %v3323_v41 }
 0x254   : > { %2979 = vmatprep.subr.bf16.mxu1 %v3324_v31 }
 0x256   : > { %1902 = vmatmul.mubr.bf16.gmra.mrb[48].mxu1 %v4069_v38  ;;  %v1641_v38 = vor.u32 %v1640_v60, %v1632_v61  ;;  %v3326_v61 = vld [vmem:[#allocation8 + $0x10] sm:$0xff]  }
 0x257   : > { %1909 = vmatprep.mubr.bf16.mxu1 %v4065_v35  ;;  %2935 = vmatprep.subr.bf16.mxu0 %v3326_v61 }
 0x258   : > { %2936 = vmatpush3.bf16.msra.mxu0 %v3326_v61 }
 0x25e   : > { %1910 = vmatmul.mubr.bf16.gmra.mrb[52].mxu1 %v4095_v24 }
 0x25f   : > { %1917 = vmatprep.mubr.bf16.mxu1 %v4091_v19 }
 0x266   : > { %1918 = vmatmul.mubr.bf16.gmra.mrb[56].mxu1 %v4118_v49 }
 0x267   : > { %1925 = vmatprep.mubr.bf16.mxu1 %v4133_v25 }
 0x26e   : > { %1926 = vmatmul.mubr.bf16.gmra.mrb[60].mxu1 %v1639_v59 }
 0x26f   : > { %2915 = vmatprep.mubr.bf16.mxu1 %v4142_v55  ;;  %v1643_v55 = vsel %vm4120_vm5, %v1641_v38, 0 }
 0x276   : > { %2916 = vmatmul.mubr.bf16.vlgmr.msra.gmra.mrb[16].mxu1 %v4150_v28 }
 0x277   : > { %2919 = vmatprep.mubr.bf16.mxu1 %v4162_v2  ;;  %2987 = vmatpush3.bf16.msra.mxu1 %v3324_v31 }
 0x278   : > { %2980 = vmatprep.subr.bf16.mxu1 %v3325_v44 }
 0x27b   : > { %2988 = vmatpush3.bf16.msra.mxu1 %v3325_v44 }
 0x27c   : > { %2981 = vmatprep.subr.bf16.mxu1 %v3326_v61 }
 0x27e   : > { %2920 = vmatmul.mubr.bf16.gmra.mrb[20].mxu1 %v4170_v7 }
 0x27f   : > { %2923 = vmatprep.mubr.bf16.mxu1 %v4182_v27  ;;  %2989 = vmatpush3.bf16.msra.mxu1 %v3326_v61 }
 0x286   : > { %2924 = vmatmul.mubr.bf16.gmra.mrb[24].mxu1 %v4190_v11 }
 0x287   : > { %2927 = vmatprep.mubr.bf16.mxu1 %v4202_v57 }
 0x289   : > { %v2595_v35 = vpop.f32.mrb[40].mxu0 }
 0x28a   : > { %v2596_v20 = vpop.f32.mrb[41].mxu0 }
 0x28b   : > { %v2597_v19 = vadd.f32 %v2596_v20, %v2595_v35  ;;  %v2598_v24 = vpop.f32.mrb[42].mxu0 }
 0x28c   : > { %v2599_v49 = vpop.f32.mrb[43].mxu0 }
 0x28d   : > { %v2600_v25 = vadd.f32 %v2599_v49, %v2598_v24 }
 0x28e   : > { %2928 = vmatmul.mubr.bf16.gmra.mrb[28].mxu1 %v1643_v55 }
 0x291   : > { %v2601_v28 = vpop.f32.mrb[44].mxu0 }
 0x292   : > { %v2602_v2 = vpop.f32.mrb[45].mxu0 }
 0x293   : > { %v2603_v7 = vadd.f32 %v2602_v2, %v2601_v28  ;;  %v2604_v27 = vpop.f32.mrb[46].mxu0  ;;  %v3327_v2 = vld [vmem:[#allocation8 + $0x18] sm:$0xff]  }
 0x294   : > { %v2605_v54 = vpop.f32.mrb[47].mxu0  ;;  %2937 = vmatprep.subr.bf16.mxu0 %v3327_v2  ;;  %2982 = vmatprep.subr.bf16.mxu1 %v3327_v2 }
 0x295   : > { %v2606_v43 = vadd.f32 %v2605_v54, %v2604_v27  ;;  %2938 = vmatpush3.bf16.msra.mxu0 %v3327_v2  ;;  %2990 = vmatpush3.bf16.msra.mxu1 %v3327_v2  ;;  %v3330_v2 = vld [vmem:[#allocation8 + $0x30] sm:$0xff]  }
 0x299   : > { %v2607_v11 = vpop.f32.mrb[48].mxu0 }
 0x29a   : > { %v2608_v48 = vpop.f32.mrb[49].mxu0 }
 0x29b   : > { %v4243_v57 = vadd.f32 %v2608_v48, %v2607_v11  ;;  %v2610_v0 = vpop.f32.mrb[50].mxu0 }
 0x29c   : > { %v2611_v37 = vpop.f32.mrb[51].mxu0 }
 0x29d   : > { %v4245_v17 = vadd.f32 %v2611_v37, %v2610_v0 }
 0x2a1   : > { %v2613_v6 = vpop.f32.mrb[52].mxu0 }
 0x2a2   : > { %v2614_v23 = vpop.f32.mrb[53].mxu0 }
 0x2a3   : > { %v4247_v51 = vadd.f32 %v2614_v23, %v2613_v6  ;;  %v2616_v39 = vpop.f32.mrb[54].mxu0 }
 0x2a4   : > { %v2617_v56 = vpop.f32.mrb[55].mxu0 }
 0x2a5   : > { %v4249_v16 = vadd.f32 %v2617_v56, %v2616_v39 }
 0x2a9   : > { %v2619_v5 = vpop.f32.mrb[0].mxu1  ;;  %v2675_v12 = vpop.f32.mrb[56].mxu0 }
 0x2aa   : > { %v2620_v1 = vpop.f32.mrb[1].mxu1  ;;  %v2676_v52 = vpop.f32.mrb[57].mxu0 }
 0x2ab   : > { %v4251_v42 = vadd.f32 %v2620_v1, %v2619_v5  ;;  %v2677_v8 = vadd.f32 %v2676_v52, %v2675_v12  ;;  %v2622_v15 = vpop.f32.mrb[2].mxu1  ;;  %v2678_v34 = vpop.f32.mrb[58].mxu0  ;;  %v3328_v5 = vld [vmem:[#allocation8 + $0x20] sm:$0xff]  }
 0x2ac   : > { %v2623_v18 = vpop.f32.mrb[3].mxu1  ;;  %v2679_v22 = vpop.f32.mrb[59].mxu0  ;;  %2939 = vmatprep.subr.bf16.mxu0 %v3328_v5  ;;  %2983 = vmatprep.subr.bf16.mxu1 %v3328_v5 }
 0x2ad   : > { %v4253_v33 = vadd.f32 %v2677_v8, %v2597_v19  ;;  %v4255_v40 = vadd.f32 %v2623_v18, %v2622_v15  ;;  %v2680_v41 = vadd.f32 %v2679_v22, %v2678_v34  ;;  %2940 = vmatpush3.bf16.msra.mxu0 %v3328_v5  ;;  %2991 = vmatpush3.bf16.msra.mxu1 %v3328_v5 }
 0x2af   : > { %v4257_v62 = vadd.f32 %v2680_v41, %v2600_v25 }
 0x2b1   : > { %v2625_v29 = vpop.f32.mrb[4].mxu1  ;;  %v2681_v30 = vpop.f32.mrb[60].mxu0 }
 0x2b2   : > { %v2626_v59 = vpop.f32.mrb[5].mxu1  ;;  %v2682_v60 = vpop.f32.mrb[61].mxu0 }
 0x2b3   : > { %v4259_v35 = vadd.f32 %v2626_v59, %v2625_v29  ;;  %v2683_v38 = vadd.f32 %v2682_v60, %v2681_v30  ;;  %v2628_v20 = vpop.f32.mrb[6].mxu1  ;;  %v2684_v19 = vpop.f32.mrb[62].mxu0  ;;  %v3329_v59 = vld [vmem:[#allocation8 + $0x28] sm:$0xff]  }
 0x2b4   : > { %v2629_v24 = vpop.f32.mrb[7].mxu1  ;;  %v2685_v49 = vpop.f32.mrb[63].mxu0  ;;  %2941 = vmatprep.subr.bf16.mxu0 %v3329_v59  ;;  %2984 = vmatprep.subr.bf16.mxu1 %v3329_v59 }
 0x2b5   : > { %v4261_v55 = vadd.f32 %v2683_v38, %v2603_v7  ;;  %v4263_v28 = vadd.f32 %v2629_v24, %v2628_v20  ;;  %v2686_v25 = vadd.f32 %v2685_v49, %v2684_v19  ;;  %2942 = vmatpush3.bf16.msra.mxu0 %v3329_v59  ;;  %2992 = vmatpush3.bf16.msra.mxu1 %v3329_v59 }
 0x2b6   : > { %2943 = vmatprep.subr.bf16.mxu0 %v3330_v2  ;;  %2985 = vmatprep.subr.bf16.mxu1 %v3330_v2 }
 0x2b7   : > { %v4265_v27 = vadd.f32 %v2686_v25, %v2606_v43 }
 0x2b9   : > { %v2631_v54 = vpop.f32.mrb[8].mxu1  ;;  %v2687_v11 = vpop.f32.mrb[64].mxu0  ;;  %2944 = vmatpush3.bf16.msra.mxu0 %v3330_v2  ;;  %2993 = vmatpush3.bf16.msra.mxu1 %v3330_v2 }
 0x2ba   : > { %v2632_v48 = vpop.f32.mrb[9].mxu1  ;;  %v2688_v0 = vpop.f32.mrb[65].mxu0 }
 0x2bb   : > { %v4267_v37 = vadd.f32 %v2632_v48, %v2631_v54  ;;  %v2689_v31 = vadd.f32 %v2688_v0, %v2687_v11  ;;  %v2634_v6 = vpop.f32.mrb[10].mxu1  ;;  %v2690_v7 = vpop.f32.mrb[66].mxu0  ;;  %v3331_v11 = vld [vmem:[#allocation8 + $0x38] sm:$0xff]  }
 0x2bc   : > { %v2635_v23 = vpop.f32.mrb[11].mxu1  ;;  %v2691_v39 = vpop.f32.mrb[67].mxu0  ;;  %2945 = vmatprep.subr.bf16.mxu0 %v3331_v11  ;;  %2986 = vmatprep.subr.bf16.mxu1 %v3331_v11 }
 0x2bd   : > { %v4270_v56 = vadd.f32 %v2689_v31, %v4243_v57  ;;  %v2636_v43 = vadd.f32 %v2635_v23, %v2634_v6  ;;  %v2692_v44 = vadd.f32 %v2691_v39, %v2690_v7  ;;  %2946 = vmatpush3.bf16.msra.mxu0 %v3331_v11  ;;  %2994 = vmatpush3.bf16.msra.mxu1 %v3331_v11 }
 0x2bf   : > { %v4273_v12 = vadd.f32 %v2692_v44, %v4245_v17 }
 0x2c1   : > { %v2637_v1 = vpop.f32.mrb[12].mxu1  ;;  %v2693_v52 = vpop.f32.mrb[68].mxu0 }
 0x2c2   : > { %v2638_v8 = vpop.f32.mrb[13].mxu1  ;;  %v2694_v15 = vpop.f32.mrb[69].mxu0 }
 0x2c3   : > { %v2639_v34 = vadd.f32 %v2638_v8, %v2637_v1  ;;  %v2695_v18 = vadd.f32 %v2694_v15, %v2693_v52  ;;  %v2640_v22 = vpop.f32.mrb[14].mxu1  ;;  %v2696_v41 = vpop.f32.mrb[70].mxu0 }
 0x2c4   : > { %v2641_v57 = vpop.f32.mrb[15].mxu1  ;;  %v2697_v61 = vpop.f32.mrb[71].mxu0 }
 0x2c5   : > { %v4276_v29 = vadd.f32 %v2695_v18, %v4247_v51  ;;  %v2642_v30 = vadd.f32 %v2641_v57, %v2640_v22  ;;  %v2698_v17 = vadd.f32 %v2697_v61, %v2696_v41 }
 0x2c7   : > { %v4279_v60 = vadd.f32 %v2698_v17, %v4249_v16 }
 0x2c9   : > { %v2699_v38 = vpop.f32.mrb[72].mxu0 }
 0x2ca   : > { %v2700_v20 = vpop.f32.mrb[73].mxu0 }
 0x2cb   : > { %v2701_v19 = vadd.f32 %v2700_v20, %v2699_v38  ;;  %v2702_v24 = vpop.f32.mrb[74].mxu0 }
 0x2cc   : > { %v2703_v49 = vpop.f32.mrb[75].mxu0 }
 0x2cd   : > { %v4282_v25 = vadd.f32 %v2701_v19, %v4251_v42  ;;  %v2704_v51 = vadd.f32 %v2703_v49, %v2702_v24 }
 0x2cf   : > { %v4285_v54 = vadd.f32 %v2704_v51, %v4255_v40 }
 0x2d1   : > { %v2705_v16 = vpop.f32.mrb[76].mxu0 }
 0x2d2   : > { %v2706_v48 = vpop.f32.mrb[77].mxu0 }
 0x2d3   : > { %v2707_v0 = vadd.f32 %v2706_v48, %v2705_v16  ;;  %v2708_v31 = vpop.f32.mrb[78].mxu0 }
 0x2d4   : > { %v2709_v6 = vpop.f32.mrb[79].mxu0 }
 0x2d5   : > { %v4288_v42 = vadd.f32 %v2707_v0, %v4259_v35  ;;  %v2710_v7 = vadd.f32 %v2709_v6, %v2708_v31 }
 0x2d7   : > { %v4291_v40 = vadd.f32 %v2710_v7, %v4263_v28 }
 0x2d9   : > { %v2711_v23 = vpop.f32.mrb[80].mxu0 }
 0x2da   : > { %v2712_v39 = vpop.f32.mrb[81].mxu0 }
 0x2db   : > { %v2713_v44 = vadd.f32 %v2712_v39, %v2711_v23  ;;  %v2714_v5 = vpop.f32.mrb[82].mxu0 }
 0x2dc   : > { %v2715_v1 = vpop.f32.mrb[83].mxu0 }
 0x2dd   : > { %v4294_v52 = vadd.f32 %v2713_v44, %v4267_v37  ;;  %v2716_v8 = vadd.f32 %v2715_v1, %v2714_v5 }
 0x2df   : > { %v4296_v15 = vadd.f32 %v2716_v8, %v2636_v43 }
 0x2e1   : > { %v2717_v18 = vpop.f32.mrb[84].mxu0 }
 0x2e2   : > { %v2718_v22 = vpop.f32.mrb[85].mxu0 }
 0x2e3   : > { %v2719_v41 = vadd.f32 %v2718_v22, %v2717_v18  ;;  %v2720_v35 = vpop.f32.mrb[86].mxu0 }
 0x2e4   : > { %v2721_v57 = vpop.f32.mrb[87].mxu0 }
 0x2e5   : > { %v4298_v61 = vadd.f32 %v2719_v41, %v2639_v34  ;;  %v2722_v28 = vadd.f32 %v2721_v57, %v2720_v35 }
 0x2e7   : > { %v4300_v17 = vadd.f32 %v2722_v28, %v2642_v30 }
 0x309   : > { %v2755_v59 = vpop.f32.mrb[32].mxu1 }
 0x30a   : > { %v2756_v38 = vpop.f32.mrb[33].mxu1 }
 0x30b   : > { %v2757_v20 = vadd.f32 %v2756_v38, %v2755_v59  ;;  %v2758_v19 = vpop.f32.mrb[34].mxu1 }
 0x30c   : > { %v2759_v24 = vpop.f32.mrb[35].mxu1 }
 0x30d   : > { %v2760_v37 = vadd.f32 %v2759_v24, %v2758_v19  ;;  %v2999_v49 = vadd.f32 %v4253_v33, %v2757_v20 }
 0x30f   : > { %v4304_v43 = vadd.f32 %v4257_v62, %v2760_v37 }
 0x311   : > { %v2761_v51 = vpop.f32.mrb[36].mxu1 }
 0x312   : > { %v2762_v2 = vpop.f32.mrb[37].mxu1 }
 0x313   : > { %v2763_v16 = vadd.f32 %v2762_v2, %v2761_v51  ;;  %v2764_v11 = vpop.f32.mrb[38].mxu1 }
 0x314   : > { %v2765_v34 = vpop.f32.mrb[39].mxu1 }
 0x315   : > { %v2766_v48 = vadd.f32 %v2765_v34, %v2764_v11  ;;  %v2996_v30 = vadd.f32 %v4261_v55, %v2763_v16 }
 0x317   : > { %v3002_v0 = vadd.f32 %v4265_v27, %v2766_v48 }
 0x319   : > { %v2767_v31 = vpop.f32.mrb[40].mxu1 }
 0x31a   : > { %v2768_v6 = vpop.f32.mrb[41].mxu1 }
 0x31b   : > { %v2769_v7 = vadd.f32 %v2768_v6, %v2767_v31  ;;  %v2770_v23 = vpop.f32.mrb[42].mxu1 }
 0x31c   : > { %v2771_v39 = vpop.f32.mrb[43].mxu1 }
 0x31d   : > { %v2772_v44 = vadd.f32 %v2771_v39, %v2770_v23  ;;  %v4309_v33 = vadd.f32 %v4270_v56, %v2769_v7 }
 0x31f   : > { %v4312_v62 = vadd.f32 %v4273_v12, %v2772_v44 }
 0x321   : > { %v2773_v5 = vpop.f32.mrb[44].mxu1 }
 0x322   : > { %v2774_v1 = vpop.f32.mrb[45].mxu1 }
 0x323   : > { %v2775_v8 = vadd.f32 %v2774_v1, %v2773_v5  ;;  %v2776_v18 = vpop.f32.mrb[46].mxu1 }
 0x324   : > { %v2777_v22 = vpop.f32.mrb[47].mxu1 }
 0x325   : > { %v2778_v55 = vadd.f32 %v2777_v22, %v2776_v18  ;;  %v3008_v27 = vadd.f32 %v4276_v29, %v2775_v8 }
 0x327   : > { %v3014_v41 = vadd.f32 %v4279_v60, %v2778_v55 }
 0x329   : > { %v2779_v35 = vpop.f32.mrb[48].mxu1 }
 0x32a   : > { %v2780_v57 = vpop.f32.mrb[49].mxu1 }
 0x32b   : > { %v2781_v28 = vadd.f32 %v2780_v57, %v2779_v35  ;;  %v2782_v59 = vpop.f32.mrb[50].mxu1 }
 0x32c   : > { %v2783_v38 = vpop.f32.mrb[51].mxu1 }
 0x32d   : > { %v2784_v56 = vadd.f32 %v2783_v38, %v2782_v59  ;;  %v4317_v20 = vadd.f32 %v4282_v25, %v2781_v28 }
 0x32f   : > { %v4320_v12 = vadd.f32 %v4285_v54, %v2784_v56 }
 0x331   : > { %v2785_v19 = vpop.f32.mrb[52].mxu1 }
 0x332   : > { %v2786_v24 = vpop.f32.mrb[53].mxu1 }
 0x333   : > { %v2787_v37 = vadd.f32 %v2786_v24, %v2785_v19  ;;  %v2788_v51 = vpop.f32.mrb[54].mxu1 }
 0x334   : > { %v2789_v2 = vpop.f32.mrb[55].mxu1 }
 0x335   : > { %v2790_v29 = vadd.f32 %v2789_v2, %v2788_v51  ;;  %v3020_v60 = vadd.f32 %v4288_v42, %v2787_v37 }
 0x337   : > { %v3026_v16 = vadd.f32 %v4291_v40, %v2790_v29 }
 0x339   : > { %v2791_v11 = vpop.f32.mrb[56].mxu1 }
 0x33a   : > { %v2792_v34 = vpop.f32.mrb[57].mxu1 }
 0x33b   : > { %v2793_v48 = vadd.f32 %v2792_v34, %v2791_v11  ;;  %v2794_v31 = vpop.f32.mrb[58].mxu1 }
 0x33c   : > { %v2795_v6 = vpop.f32.mrb[59].mxu1 }
 0x33d   : > { %v2796_v25 = vadd.f32 %v2795_v6, %v2794_v31  ;;  %v4325_v7 = vadd.f32 %v4294_v52, %v2793_v48  ;;  %v4337_v52 = vld [vmem:[%s4520_s4] ss:$0 sm:$0xff] }
 0x33f   : > { %v4328_v54 = vadd.f32 %v4296_v15, %v2796_v25 }
 0x341   : > { %v2797_v23 = vpop.f32.mrb[60].mxu1 }
 0x342   : > { %v2798_v39 = vpop.f32.mrb[61].mxu1 }
 0x343   : > { %v2799_v44 = vadd.f32 %v2798_v39, %v2797_v23  ;;  %v2800_v5 = vpop.f32.mrb[62].mxu1 }
 0x344   : > { %v2801_v1 = vpop.f32.mrb[63].mxu1 }
 0x345   : > { %v2802_v42 = vadd.f32 %v2801_v1, %v2800_v5  ;;  %v3032_v40 = vadd.f32 %v4298_v61, %v2799_v44 }
 0x347   : > { %v4332_v8 = vadd.f32 %v4300_v17, %v2802_v42 }
 0x349   : > { %v2917_v18 = vpop.f32.mrb[16].mxu1 }
 0x34a   : > { %v2997_v22 = vadd.f32 %v2996_v30, %v2917_v18  ;;  %v1968_v15 = vpop.f32.mrb[17].mxu1 }
 0x34b   : > { %v3000_v55 = vadd.f32 %v2999_v49, %v1968_v15  ;;  %v2918_v35 = vpop.f32.mrb[18].mxu1 }
 0x34c   : > { %v2056_v57 = vadd.f32 %v2997_v22, %v4337_v52  ;;  %v3003_v28 = vadd.f32 %v3002_v0, %v2918_v35  ;;  %v1971_v59 = vpop.f32.mrb[19].mxu1 }
 0x34d   : > { %v2054_v38 = vadd.f32 %v3000_v55, %v4337_v52  ;;  %v3006_v61 = vadd.f32 %v4304_v43, %v1971_v59 }
 0x34e   : > { %v2057_v17 = vadd.f32 %v3003_v28, %v4337_v52  ;;  %v2072_v19 = vmax.f32 %v2056_v57, 0.0 }
 0x34f   : > { %v2055_v56 = vadd.f32 %v3006_v61, %v4337_v52  ;;  %v2070_v37 = vmax.f32 %v2054_v38, 0.0 }
 0x350   : > { %v2073_v24 = vmax.f32 %v2057_v17, 0.0 }
 0x351   : > { %v2071_v51 = vmax.f32 %v2055_v56, 0.0  ;;  %v2921_v30 = vpop.f32.mrb[20].mxu1 }
 0x352   : > { %v2087_v2 = vpack.c.bf16 %v2073_v24, %v2072_v19  ;;  %v3009_v49 = vadd.f32 %v3008_v27, %v2921_v30  ;;  %v1984_v29 = vpop.f32.mrb[21].mxu1 }
 0x353   : > { %v3012_v11 = vadd.f32 %v4309_v33, %v1984_v29  ;;  %v2922_v0 = vpop.f32.mrb[22].mxu1  ;;  %v2086_v34 = vpack.c.bf16 %v2071_v51, %v2070_v37 }
 0x354   : > { %v2060_v48 = vadd.f32 %v3009_v49, %v4337_v52  ;;  %v3015_v31 = vadd.f32 %v3014_v41, %v2922_v0  ;;  %v1987_v43 = vpop.f32.mrb[23].mxu1 }
 0x355   : > { %v2058_v6 = vadd.f32 %v3012_v11, %v4337_v52  ;;  %v3018_v25 = vadd.f32 %v4312_v62, %v1987_v43  ;;  %2947 = vmatprep.mubr.bf16.mxu0 %v2086_v34 }
 0x356   : > { %v2061_v23 = vadd.f32 %v3015_v31, %v4337_v52  ;;  %2948 = vmatmul.mubr.bf16.vlgmr.msra.gmra.mrb[88].mxu0 %v2087_v2  ;;  %v2076_v27 = vmax.f32 %v2060_v48, 0.0 }
 0x357   : > { %v2059_v39 = vadd.f32 %v3018_v25, %v4337_v52  ;;  %v2074_v5 = vmax.f32 %v2058_v6, 0.0 }
 0x358   : > { %v2077_v44 = vmax.f32 %v2061_v23, 0.0 }
 0x359   : > { %v2075_v33 = vmax.f32 %v2059_v39, 0.0  ;;  %v2925_v1 = vpop.f32.mrb[24].mxu1 }
 0x35a   : > { %v3021_v42 = vadd.f32 %v3020_v60, %v2925_v1  ;;  %v2000_v18 = vpop.f32.mrb[25].mxu1  ;;  %v2089_v22 = vpack.c.bf16 %v2077_v44, %v2076_v27 }
 0x35b   : > { %v3024_v41 = vadd.f32 %v4317_v20, %v2000_v18  ;;  %v2926_v15 = vpop.f32.mrb[26].mxu1  ;;  %v2088_v55 = vpack.c.bf16 %v2075_v33, %v2074_v5 }
 0x35c   : > { %v2064_v62 = vadd.f32 %v3021_v42, %v4337_v52  ;;  %v3027_v35 = vadd.f32 %v3026_v16, %v2926_v15  ;;  %v2003_v57 = vpop.f32.mrb[27].mxu1 }
 0x35d   : > { %v2062_v28 = vadd.f32 %v3024_v41, %v4337_v52  ;;  %v3030_v59 = vadd.f32 %v4320_v12, %v2003_v57  ;;  %2951 = vmatprep.mubr.bf16.mxu0 %v2088_v55 }
 0x35e   : > { %v2065_v38 = vadd.f32 %v3027_v35, %v4337_v52  ;;  %2952 = vmatmul.mubr.bf16.gmra.mrb[92].mxu0 %v2089_v22  ;;  %v2080_v61 = vmax.f32 %v2064_v62, 0.0 }
 0x35f   : > { %v2063_v60 = vadd.f32 %v3030_v59, %v4337_v52  ;;  %v2078_v56 = vmax.f32 %v2062_v28, 0.0 }
 0x360   : > { %v2081_v17 = vmax.f32 %v2065_v38, 0.0 }
 0x361   : > { %v2079_v20 = vmax.f32 %v2063_v60, 0.0  ;;  %v2929_v19 = vpop.f32.mrb[28].mxu1 }
 0x362   : > { %v3033_v24 = vadd.f32 %v3032_v40, %v2929_v19  ;;  %v2016_v37 = vpop.f32.mrb[29].mxu1  ;;  %v2091_v51 = vpack.c.bf16 %v2081_v17, %v2080_v61 }
 0x363   : > { %v3036_v16 = vadd.f32 %v4325_v7, %v2016_v37  ;;  %v2930_v30 = vpop.f32.mrb[30].mxu1  ;;  %v2090_v2 = vpack.c.bf16 %v2079_v20, %v2078_v56 }
 0x364   : > { %v2068_v12 = vadd.f32 %v3033_v24, %v4337_v52  ;;  %v3039_v49 = vadd.f32 %v4332_v8, %v2930_v30  ;;  %v2019_v29 = vpop.f32.mrb[31].mxu1  ;;  %v405_v8 = vsub.s32 1, %v3914_v46 }
 0x365   : > { %v2066_v11 = vadd.f32 %v3036_v16, %v4337_v52  ;;  %v3042_v0 = vadd.f32 %v4328_v54, %v2019_v29  ;;  %2955 = vmatprep.mubr.bf16.mxu0 %v2090_v2  ;;  %v3332_v54 = vld [vmem:[%s4518_s2] sm:$0x3] }
 0x366   : > { %v2069_v34 = vadd.f32 %v3039_v49, %v4337_v52  ;;  %2956 = vmatmul.mubr.bf16.gmra.mrb[96].mxu0 %v2091_v51  ;;  %v2084_v48 = vmax.f32 %v2068_v12, 0.0  ;;  %v4367_v23 = vrot.slane %v3332_v54, %v405_v8 }
 0x367   : > { %v2067_v40 = vadd.f32 %v3042_v0, %v4337_v52  ;;  %v2082_v31 = vmax.f32 %v2066_v11, 0.0  ;;  %v4373_v52 = vld [vmem:[%s4577_s23] ss:$0 sm:$0xff]  ;;  %s3588_s23 = smov [#allocation10]  }
 0x368   : > { %v2085_v7 = vmax.f32 %v2069_v34, 0.0  ;;  %v604_v39 = vadd.f32 %v3939_v10, %v4367_v23  ;;  %v594_v27 = vadd.f32 %v3928_v63, %v4367_v23  ;;  %v608_v46 = vadd.f32 %v3943_v13, %v4367_v23  ;;  %s3451_s5 = sshll.u32 %s3588_s23, 4  ;;  %s3452_s5 = int_to_ptr.vmem [resolvable:$false] %s3451_s5 }
 0x369   : > { %v2083_v43 = vmax.f32 %v2067_v40, 0.0  ;;  %v598_v1 = vadd.f32 %v3933_v3, %v4367_v23  ;;  %v624_v3 = vadd.f32 %v3982_v45, %v4367_v23  ;;  %v614_v61 = vadd.f32 %v3962_v26, %v4367_v23  ;;  %s3453_s14 = scalar_lea.vmem %s3452_s5, 4096  ;;  %p3454_p11 = scmp.lt.s32.totalorder %s4448_s24, %s3452_s5 }
 0x36a   : > { %v2093_v6 = vpack.c.bf16 %v2085_v7, %v2084_v48  ;;  %v685_v22 = vmax.f32 %v604_v39, 0.0  ;;  %v681_v15 = vmax.f32 %v594_v27, 0.0  ;;  %v687_v62 = vmax.f32 %v608_v46, 0.0  ;;  %p3455_p5 = scmp.lt.s32.totalorder %s3453_s14, %s3447_s13 }
 0x36b   : > { %v2092_v25 = vpack.c.bf16 %v2083_v43, %v2082_v31  ;;  %v683_v28 = vmax.f32 %v598_v1, 0.0  ;;  %v628_v20 = vadd.f32 %v3987_v53, %v4367_v23  ;;  %v618_v24 = vadd.f32 %v3967_v32, %v4367_v23 }
 0x36c   : > { %v693_v16 = vmax.f32 %v624_v3, 0.0  ;;  %v689_v12 = vmax.f32 %v614_v61, 0.0  ;;  %v644_v48 = vadd.f32 %v4025_v36, %v4367_v23  ;;  %v634_v31 = vadd.f32 %v4002_v4, %v4367_v23  ;;  %p3456_p8 = por %p3455_p5, %p3454_p11 }
 0x36d   : > { %2959 = vmatprep.mubr.bf16.mxu1 %v2092_v25  ;;  %v695_v29 = vmax.f32 %v628_v20, 0.0  ;;  %v691_v32 = vmax.f32 %v618_v24, 0.0  ;;  %v648_v25 = vadd.f32 %v4032_v47, %v4367_v23  ;;  %v638_v39 = vadd.f32 %v4007_v14, %v4367_v23 }
 0x36e   : > { %2960 = vmatmul.mubr.bf16.vlgmr.msra.gmra.mrb[64].mxu1 %v2093_v6  ;;  %v701_v4 = vmax.f32 %v644_v48, 0.0  ;;  %v697_v47 = vmax.f32 %v634_v31, 0.0  ;;  %p3457_p12 = pnand %p3456_p8, %p3450_p9 }
 0x429   : > { %v2949_v44 = vpop.f32.mrb[88].mxu0 }
 0x42a   : > { %v2208_v5 = vadd.f32 %v2949_v44, %v4373_v52  ;;  %v2199_v33 = vpop.f32.mrb[89].mxu0 }
 0x42b   : > { %v2200_v42 = vadd.f32 %v4373_v52, %v2199_v33  ;;  %v2950_v18 = vpop.f32.mrb[90].mxu0 }
 0x42c   : > { %v2264_v10 = vmax.f32 %v2208_v5, 0.0  ;;  %v2211_v41 = vadd.f32 %v2950_v18, %v4373_v52  ;;  %v2202_v63 = vpop.f32.mrb[91].mxu0 }
 0x42d   : > { %v2262_v55 = vmax.f32 %v2200_v42, 0.0  ;;  %v2203_v13 = vadd.f32 %v4373_v52, %v2202_v63  ;;  %v703_v42 = vmax.f32 %v648_v25, 0.0  ;;  %v664_v63 = vadd.f32 %v4076_v50, %v4367_v23 }
 0x42e   : > { %v2280_v35 = vadd.f32 %v2264_v10, %v685_v22  ;;  %v2265_v57 = vmax.f32 %v2211_v41, 0.0  ;;  %v699_v22 = vmax.f32 %v638_v39, 0.0  ;;  %v658_v50 = vadd.f32 %v4058_v21, %v4367_v23 }
 0x42f   : > { %v2278_v59 = vadd.f32 %v2262_v55, %v681_v15  ;;  %v2263_v38 = vmax.f32 %v2203_v13, 0.0  ;;  %v654_v55 = vadd.f32 %v4052_v9, %v4367_v23  ;;  %v709_v9 = vmax.f32 %v664_v63, 0.0 }
 0x430   : > { %2296 = vst [vmem:[%s4391_s16 + $0x10] sm:$0xff] %v2280_v35  ;;  %v2281_v60 = vadd.f32 %v2265_v57, %v687_v62  ;;  %v668_v35 = vadd.f32 %v4082_v58, %v4367_v23 }
 0x431   : > { %2294 = vst [vmem:[%s4391_s16] sm:$0xff] %v2278_v59  ;;  %v2279_v17 = vadd.f32 %v2263_v38, %v683_v28  ;;  %v2953_v56 = vpop.f32.mrb[92].mxu0  ;;  %v705_v58 = vmax.f32 %v654_v55, 0.0 }
 0x432   : > { %2297 = vst [vmem:[%s4391_s16 + $0x18] sm:$0xff] %v2281_v60  ;;  %v2224_v45 = vadd.f32 %v2953_v56, %v4373_v52  ;;  %v2215_v19 = vpop.f32.mrb[93].mxu0  ;;  %v711_v21 = vmax.f32 %v668_v35, 0.0 }
 0x433   : > { %2295 = vst [vmem:[%s4391_s16 + $0x8] sm:$0xff] %v2279_v17  ;;  %v2216_v37 = vadd.f32 %v4373_v52, %v2215_v19  ;;  %v2954_v51 = vpop.f32.mrb[94].mxu0 }
 0x434   : > { %v2268_v26 = vmax.f32 %v2224_v45, 0.0  ;;  %v2227_v30 = vadd.f32 %v2954_v51, %v4373_v52  ;;  %v2218_v2 = vpop.f32.mrb[95].mxu0  ;;  %v707_v45 = vmax.f32 %v658_v50, 0.0 }
 0x435   : > { %v2266_v53 = vmax.f32 %v2216_v37, 0.0  ;;  %v2219_v49 = vadd.f32 %v4373_v52, %v2218_v2 }
 0x436   : > { %v2284_v11 = vadd.f32 %v2268_v26, %v693_v16  ;;  %v2269_v0 = vmax.f32 %v2227_v30, 0.0 }
 0x437   : > { %v2282_v34 = vadd.f32 %v2266_v53, %v689_v12  ;;  %v2267_v40 = vmax.f32 %v2219_v49, 0.0 }
 0x438   : > { %2300 = vst [vmem:[%s4391_s16 + $0x30] sm:$0xff] %v2284_v11  ;;  %v2285_v7 = vadd.f32 %v2269_v0, %v695_v29 }
 0x439   : > { %2298 = vst [vmem:[%s4391_s16 + $0x20] sm:$0xff] %v2282_v34  ;;  %v2283_v43 = vadd.f32 %v2267_v40, %v691_v32  ;;  %v2957_v6 = vpop.f32.mrb[96].mxu0 }
 0x43a   : > { %2301 = vst [vmem:[%s4391_s16 + $0x38] sm:$0xff] %v2285_v7  ;;  %v2240_v8 = vadd.f32 %v2957_v6, %v4373_v52  ;;  %v2231_v54 = vpop.f32.mrb[97].mxu0 }
 0x43b   : > { %2299 = vst [vmem:[%s4391_s16 + $0x28] sm:$0xff] %v2283_v43  ;;  %v2232_v36 = vadd.f32 %v4373_v52, %v2231_v54  ;;  %v2958_v27 = vpop.f32.mrb[98].mxu0 }
 0x43c   : > { %v2272_v44 = vmax.f32 %v2240_v8, 0.0  ;;  %v2243_v46 = vadd.f32 %v2958_v27, %v4373_v52  ;;  %v2234_v5 = vpop.f32.mrb[99].mxu0 }
 0x43d   : > { %v2270_v33 = vmax.f32 %v2232_v36, 0.0  ;;  %v2235_v1 = vadd.f32 %v4373_v52, %v2234_v5 }
 0x43e   : > { %v2288_v14 = vadd.f32 %v2272_v44, %v701_v4  ;;  %v2273_v18 = vmax.f32 %v2243_v46, 0.0 }
 0x43f   : > { %v2286_v10 = vadd.f32 %v2270_v33, %v697_v47  ;;  %v2271_v41 = vmax.f32 %v2235_v1, 0.0 }
 0x440   : > { %2304 = vst [vmem:[%s4391_s16 + $0x50] sm:$0xff] %v2288_v14  ;;  %v2289_v15 = vadd.f32 %v2273_v18, %v703_v42 }
 0x441   : > { %2302 = vst [vmem:[%s4391_s16 + $0x40] sm:$0xff] %v2286_v10  ;;  %v2287_v13 = vadd.f32 %v2271_v41, %v699_v22  ;;  %v2961_v62 = vpop.f32.mrb[64].mxu1 }
 0x442   : > { %2305 = vst [vmem:[%s4391_s16 + $0x58] sm:$0xff] %v2289_v15  ;;  %v2256_v57 = vadd.f32 %v2961_v62, %v4373_v52  ;;  %v2247_v28 = vpop.f32.mrb[65].mxu1 }
 0x443   : > { %2303 = vst [vmem:[%s4391_s16 + $0x48] sm:$0xff] %v2287_v13  ;;  %v2248_v59 = vadd.f32 %v4373_v52, %v2247_v28  ;;  %v2962_v38 = vpop.f32.mrb[66].mxu1 }
 0x444   : > { %v2276_v3 = vmax.f32 %v2256_v57, 0.0  ;;  %v2259_v60 = vadd.f32 %v2962_v38, %v4373_v52  ;;  %v2250_v61 = vpop.f32.mrb[67].mxu1 }
 0x445   : > { %v2274_v17 = vmax.f32 %v2248_v59, 0.0  ;;  %v2251_v56 = vadd.f32 %v4373_v52, %v2250_v61 }
 0x446   : > { %v2292_v23 = vadd.f32 %v2276_v3, %v709_v9  ;;  %v2277_v20 = vmax.f32 %v2259_v60, 0.0 }
 0x447   : > { %v2290_v19 = vadd.f32 %v2274_v17, %v705_v58  ;;  %v2275_v24 = vmax.f32 %v2251_v56, 0.0 }
 0x448   : > { %2308 = vst [vmem:[%s4391_s16 + $0x70] sm:$0xff] %v2292_v23  ;;  %v2293_v37 = vadd.f32 %v2277_v20, %v711_v21 }
 0x449   : > { %2306 = vst [vmem:[%s4391_s16 + $0x60] sm:$0xff] %v2290_v19  ;;  %v2291_v52 = vadd.f32 %v2275_v24, %v707_v45 }
 0x44a   : > { %2309 = vst [vmem:[%s4391_s16 + $0x78] sm:$0xff] %v2293_v37 }
 0x44b   : > { %2307 = vst [vmem:[%s4391_s16 + $0x68] sm:$0xff] %v2291_v52 }
 0x44c   : > { %3460 = shalt.err (!%p3457_p12)
}
 0x44d   : > { %s3461_s8 = scalar_lea.hbm %s4446_s3, 2048  ;;  %s3465_s19 = scalar_lea.hbm %s4580_s6, 8192 }
 0x44e   : > { %p3462_p2 = scmp.ne.s32.totalorder %s4446_s3, %s3461_s8  ;;  %p3466_p0 = scmp.lt.u32.totalorder %s4446_s3, %s4580_s6 }
 0x44f   : > { %p3467_p4 = scmp.lt.u32.totalorder %s3465_s19, %s3461_s8  ;;  %p3469_p3 = scmp.lt.u32.totalorder %s3461_s8, %s4446_s3 }
 0x450   : > { %p3463_p6 = pnand %p3462_p2, %p4581_p7 }
 0x451   : > { %p3468_p1 = por %p3467_p4, %p3466_p0 }
 0x452   : > { %p3464_p10 = pneg %p3463_p6 }
 0x453   : > { %p3470_p13 = por %p3469_p3, %p3468_p1 }
 0x455   : > { %p3471_p9 = pnand %p3470_p13, %p3464_p10 }
 0x457   : > { %3474 = shalt.err (!%p3471_p9)
}
 0x458   : > { %s3589_s17 = smov 128   ;;  %s3590_s12 = smov 8  }
 0x459   : > { %3092 = dma.vmem_to_hbm [thread:$0]  (%p4581_p7), %s4448_s24, 2048, %s4446_s3, %s4455_s18, %s3589_s17, %s3589_s17, %s3590_s12  }
 0x45a PF: > { %s4582_s27 = sld [smem:[#allocation15_spill]]  ;;  %s4583_s13 = sld [smem:[#allocation19_spill]] }
 0x45b   : > { %p3119_p11 = scmp.ge.s32.totalorder %s3577_s11, 2 }
 0x460   : > { %s2342_s23 = sand.u32 1, %s4582_s27   ;;  %p4584_p5 = scmp.ne.s32.totalorder %s4583_s13, 0 }
 0x461   : > { %s2343_s5 = scalar_lea.sflag [#allocation4], %s2342_s23 }
 0x462   : > { %p3109_p8 = pnand %p3119_p11, %p4584_p5 }
 0x464   : > { %3532 = dma.done.wait (!%p3109_p8), %s2343_s5, 2048  }
 0x465   : > { %3534 = vsyncadd (!%p3109_p8), %s2343_s5, 4294965248  ;;  %s25_s11 = sadd.s32 1, %s3577_s11   ;;  %s4585_s24 = sld [smem:[#allocation16_spill]] }
 0x466   : > { %p22_p12 = scmp.ge.s32.totalorder %s25_s11, 6   ;;  %s4586_s25 = smov %s3545_s26 }
 0x467   : > { %s4587_s26 = smov %s3825_s1  ;;  %s4588_s27 = smov %s3553_s28 }
 0x468   : > { %s4589_s28 = smov %s3557_s29  ;;  %s4590_s29 = smov %s3820_s21 }
 0x469   : > { %s4591_s30 = smov %s3569_s9  ;;  %s4592_s8 = smov %s3573_s10 }
 0x46a   : > { %s4593_s9 = smov %s4596_s20  ;;  %s4594_s10 = smov %s4600_s22 }
 0x46b   :  { %24 = sbr.rel (!%p22_p12) target bundleno = 17 (0x11), region = 108 }
 0x472   :  { %2348 = vsyncpa [#allocation3], 1 }
 0x473   :  { %2350 = vsyncpa [#allocation3 + $0x1], 1 }
 0x474   :  { %2351 = vsyncpa [#allocation6], 1 }
 0x475   :  { %2352 = vsyncpa [#allocation9], 1 }
 0x476   :  { %2353 = vsyncpa [#allocation4], 1 }
 0x477   :  { %2355 = vsyncpa [#allocation4 + $0x1], 1 }

</bundles_post_ra>
